<compile_context>
chip_gen: v5e
topology: v5e:2x2
jax: 0.10.0
libtpu: 0.0.40
codegen_flags: <defaults>
</compile_context>

<pallas_src>
import functools

import jax
import jax.numpy as jnp
from jax.experimental import pallas as pl
from jax.experimental.pallas import tpu as pltpu


def _corr_kernel(f1_ref, f2_ref, out_ref, f2pad_ref, *, H, W, md):
    # f1_ref   : (1, C, H*W)          feature map 1 (one batch element, flat)
    # f2_ref   : (1, C, H*W)          feature map 2 (one batch element, flat)
    # out_ref  : (1, D*D, H*W)        correlation volume, lane-dense last dim
    # f2pad_ref: (C, H*W + 2*S) f32   VMEM scratch = zero-padded flat f2
    D = 2 * md + 1
    HW = H * W
    S = md * W + md                       # max |flat shift| = dy*W + dx

    # Promote once to f32 (accumulate the channel reduction in float32).
    f1 = f1_ref[0].astype(jnp.float32)    # (C, HW)
    f2 = f2_ref[0].astype(jnp.float32)    # (C, HW)
    C = f1.shape[0]

    # Zero-pad feature map 2 *inside* the kernel, into a flat VMEM scratch.
    # Flat lane index p = h*W + w; zeros at both ends absorb all y-boundary
    # (and corner) displacements, so no y-mask is needed below.
    if S > 0:
        f2pad_ref[:, :S] = jnp.zeros((C, S), jnp.float32)
        f2pad_ref[:, S + HW:] = jnp.zeros((C, S), jnp.float32)
    f2pad_ref[:, S:S + HW] = f2

    # Hoisted x-boundary masks (one per dx); depend only on w = p % W.
    col = jax.lax.broadcasted_iota(jnp.int32, (1, HW), 1) % W
    x_valid = [(col + dx >= 0) & (col + dx < W) for dx in range(-md, md + 1)]

    # Fully unrolled displacement loops (D is small & static).  Each (dy, dx)
    # is one static lane-realigning slice of the padded scratch, an f32
    # multiply + channel reduce, an x-boundary mask, and one streaming,
    # lane-dense store of that displacement's row.
    for dyi in range(D):
        dy = dyi - md
        for dxi in range(D):
            dx = dxi - md
            s = dy * W + dx
            shifted = f2pad_ref[:, S + s:S + s + HW]              # (C, HW) f32
            corr = jnp.sum(f1 * shifted, axis=0, keepdims=True)   # (1, HW) f32
            corr = jnp.where(x_valid[dxi], corr, 0.0)
            d = dyi * D + dxi
            out_ref[0, d:d + 1, :] = corr.astype(out_ref.dtype)


def correlation_layer(feature_map_1, feature_map_2, *, max_displacement=20):
    """Pallas implementation of CorrelationLayer.forward.

    Args:
      feature_map_1: (N, C, H, W)
      feature_map_2: (N, C, H, W)
    Returns:
      (N, 1, H, W, (2*max_displacement+1)**2)
    """
    N, C, H, W = feature_map_1.shape
    md = max_displacement
    D = 2 * md + 1
    HW = H * W
    S = md * W + md

    # Free (contiguous) reshape to the lane-dense flat layout; no jnp.pad here.
    f1_flat = feature_map_1.reshape(N, C, HW)
    f2_flat = feature_map_2.reshape(N, C, HW)

    kernel = functools.partial(_corr_kernel, H=H, W=W, md=md)

    out_flat = pl.pallas_call(
        kernel,
        out_shape=jax.ShapeDtypeStruct((N, D * D, HW), feature_map_1.dtype),
        grid=(N,),
        in_specs=[
            pl.BlockSpec((1, C, HW), lambda n: (n, 0, 0)),
            pl.BlockSpec((1, C, HW), lambda n: (n, 0, 0)),
        ],
        out_specs=pl.BlockSpec((1, D * D, HW), lambda n: (n, 0, 0)),
        scratch_shapes=[pltpu.VMEM((C, HW + 2 * S), jnp.float32)],
        compiler_params=pltpu.CompilerParams(
            dimension_semantics=("parallel",),
            # Ample for these block sizes (a few hundred KiB per step with
            # double buffering); raise for larger feature maps / displacements.
            vmem_limit_bytes=32 * 1024 * 1024,
        ),
    )(f1_flat, f2_flat)

    # Glue (XLA): the module's output layout (N, 1, H, W, D*D) has an
    # inherently non-lane-dense last dim (D*D), so the permute stays in the
    # wrapper rather than forcing strided stores inside the kernel.
    corr_vol = out_flat.reshape(N, D * D, H, W)
    corr_vol = jnp.transpose(corr_vol, (0, 2, 3, 1))     # (N, H, W, D*D)
    return corr_vol[:, None, :, :, :]                    # (N, 1, H, W, D*D)


def correlation_layer_ref(f1, f2, *, max_displacement=20):
    """Pure-JAX reference mirroring the PyTorch loop exactly."""
    N, C, H, W = f1.shape
    md = max_displacement
    f2p = jnp.pad(f2, ((0, 0), (0, 0), (md, md), (md, md)))
    maps = []
    for dy in range(-md, md + 1):
        for dx in range(-md, md + 1):
            shifted = f2p[:, :, md + dy:md + dy + H, md + dx:md + dx + W]
            maps.append(jnp.sum(f1 * shifted, axis=1, keepdims=True))
    vol = jnp.concatenate(maps, axis=1)                  # (N, D*D, H, W)
    return jnp.transpose(vol, (0, 2, 3, 1))[:, None]     # (N, 1, H, W, D*D)


if __name__ == "__main__":
    key = jax.random.PRNGKey(0)
    k1, k2 = jax.random.split(key)

    N, C, H, W = 2, 8, 16, 16
    max_displacement = 2   # small displacement for the synthetic example

    f1 = jax.random.normal(k1, (N, C, H, W), dtype=jnp.float32)
    f2 = jax.random.normal(k2, (N, C, H, W), dtype=jnp.float32)

    out = correlation_layer(f1, f2, max_displacement=max_displacement)
    out = jax.block_until_ready(out)

    ref = correlation_layer_ref(f1, f2, max_displacement=max_displacement)
    assert out.shape == (N, 1, H, W, (2 * max_displacement + 1) ** 2), out.shape
    assert jnp.allclose(out, ref, atol=1e-5, rtol=1e-5), "mismatch vs reference"

    print("KERNEL_OK")
</pallas_src>

<mosaic_0001>
module attributes {stable_mosaic.version = 11 : i64} {
  func.func @_corr_kernel(%arg0: i32, %arg1: memref<1x8x256xf32, #tpu.memory_space<vmem>>, %arg2: memref<1x8x256xf32, #tpu.memory_space<vmem>>, %arg3: memref<1x25x256xf32, #tpu.memory_space<vmem>>, %arg4: memref<8x324xf32, #tpu.memory_space<vmem>>) attributes {dimension_semantics = [#tpu.dimension_semantics<parallel>], iteration_bounds = array<i64: 2>, scalar_prefetch = 0 : i64, scratch_operands = 1 : i64, tpu.core_type = #tpu.core_type<tc>, window_params = [{transform_indices = @transform_0, window_bounds = array<i64: 1, 8, 256>}, {transform_indices = @transform_1, window_bounds = array<i64: 1, 8, 256>}, {transform_indices = @transform_2, window_bounds = array<i64: 1, 25, 256>}]} {
    %c0 = arith.constant 0 : index
    %c0_0 = arith.constant 0 : index
    %c0_1 = arith.constant 0 : index
    %0 = vector.load %arg1[%c0, %c0_0, %c0_1] : memref<1x8x256xf32, #tpu.memory_space<vmem>>, vector<1x8x256xf32>
    %1 = vector.shape_cast %0 : vector<1x8x256xf32> to vector<8x256xf32>
    %c0_2 = arith.constant 0 : index
    %c0_3 = arith.constant 0 : index
    %c0_4 = arith.constant 0 : index
    %2 = vector.load %arg2[%c0_2, %c0_3, %c0_4] : memref<1x8x256xf32, #tpu.memory_space<vmem>>, vector<1x8x256xf32>
    %3 = vector.shape_cast %2 : vector<1x8x256xf32> to vector<8x256xf32>
    %cst = arith.constant 0.000000e+00 : f32
    %4 = vector.broadcast %cst : f32 to vector<8x34xf32>
    %c0_5 = arith.constant 0 : index
    %c0_6 = arith.constant 0 : index
    %5 = vector.load %arg4[%c0_5, %c0_6] : memref<8x324xf32, #tpu.memory_space<vmem>>, vector<8x34xf32>
    tpu.vector_store %arg4[%c0_5, %c0_6], %4 {strides = array<i32>} : memref<8x324xf32, #tpu.memory_space<vmem>>, vector<8x34xf32>,
    %cst_7 = arith.constant 0.000000e+00 : f32
    %6 = vector.broadcast %cst_7 : f32 to vector<8x34xf32>
    %c0_8 = arith.constant 0 : index
    %c290 = arith.constant 290 : index
    %7 = vector.load %arg4[%c0_8, %c290] : memref<8x324xf32, #tpu.memory_space<vmem>>, vector<8x34xf32>
    tpu.vector_store %arg4[%c0_8, %c290], %6 {strides = array<i32>} : memref<8x324xf32, #tpu.memory_space<vmem>>, vector<8x34xf32>,
    %c0_9 = arith.constant 0 : index
    %c34 = arith.constant 34 : index
    %8 = vector.load %arg4[%c0_9, %c34] : memref<8x324xf32, #tpu.memory_space<vmem>>, vector<8x256xf32>
    tpu.vector_store %arg4[%c0_9, %c34], %3 {strides = array<i32>} : memref<8x324xf32, #tpu.memory_space<vmem>>, vector<8x256xf32>,
    %9 = tpu.iota {dimensions = array<i32: 1>} : vector<1x256xi32>
    %c16_i32 = arith.constant 16 : i32
    %c0_i32 = arith.constant 0 : i32
    %10 = arith.cmpi eq, %c16_i32, %c0_i32 : i32
    %c1_i32 = arith.constant 1 : i32
    %11 = arith.select %10, %c1_i32, %c16_i32 : i32
    %12 = vector.broadcast %11 : i32 to vector<1x256xi32>
    %13 = arith.remsi %9, %12 : vector<1x256xi32>
    %c0_i32_10 = arith.constant 0 : i32
    %14 = vector.broadcast %c0_i32_10 : i32 to vector<1x256xi32>
    %15 = arith.cmpi ne, %13, %14 : vector<1x256xi32>
    %c0_i32_11 = arith.constant 0 : i32
    %16 = vector.broadcast %c0_i32_11 : i32 to vector<1x256xi32>
    %17 = arith.cmpi slt, %13, %16 : vector<1x256xi32>
    %c0_i32_12 = arith.constant 0 : i32
    %18 = arith.cmpi slt, %11, %c0_i32_12 : i32
    %19 = vector.broadcast %18 : i1 to vector<1x256xi1>
    %20 = vector.broadcast %19 : vector<1x256xi1> to vector<1x256xi1>
    %21 = arith.xori %17, %20 : vector<1x256xi1>
    %22 = arith.andi %21, %15 : vector<1x256xi1>
    %23 = vector.broadcast %11 : i32 to vector<1x256xi32>
    %24 = arith.addi %13, %23 : vector<1x256xi32>
    %25 = arith.select %22, %24, %13 : vector<1x256xi1>, vector<1x256xi32>
    %c-2_i32 = arith.constant -2 : i32
    %26 = vector.broadcast %c-2_i32 : i32 to vector<1x256xi32>
    %27 = arith.addi %25, %26 : vector<1x256xi32>
    %c0_i32_13 = arith.constant 0 : i32
    %28 = vector.broadcast %c0_i32_13 : i32 to vector<1x256xi32>
    %29 = arith.cmpi sge, %27, %28 : vector<1x256xi32>
    %c-2_i32_14 = arith.constant -2 : i32
    %30 = vector.broadcast %c-2_i32_14 : i32 to vector<1x256xi32>
    %31 = arith.addi %25, %30 : vector<1x256xi32>
    %c16_i32_15 = arith.constant 16 : i32
    %32 = vector.broadcast %c16_i32_15 : i32 to vector<1x256xi32>
    %33 = arith.cmpi slt, %31, %32 : vector<1x256xi32>
    %34 = arith.andi %29, %33 : vector<1x256xi1>
    %c-1_i32 = arith.constant -1 : i32
    %35 = vector.broadcast %c-1_i32 : i32 to vector<1x256xi32>
    %36 = arith.addi %25, %35 : vector<1x256xi32>
    %c0_i32_16 = arith.constant 0 : i32
    %37 = vector.broadcast %c0_i32_16 : i32 to vector<1x256xi32>
    %38 = arith.cmpi sge, %36, %37 : vector<1x256xi32>
    %c-1_i32_17 = arith.constant -1 : i32
    %39 = vector.broadcast %c-1_i32_17 : i32 to vector<1x256xi32>
    %40 = arith.addi %25, %39 : vector<1x256xi32>
    %c16_i32_18 = arith.constant 16 : i32
    %41 = vector.broadcast %c16_i32_18 : i32 to vector<1x256xi32>
    %42 = arith.cmpi slt, %40, %41 : vector<1x256xi32>
    %43 = arith.andi %38, %42 : vector<1x256xi1>
    %c0_i32_19 = arith.constant 0 : i32
    %44 = vector.broadcast %c0_i32_19 : i32 to vector<1x256xi32>
    %45 = arith.addi %25, %44 : vector<1x256xi32>
    %c0_i32_20 = arith.constant 0 : i32
    %46 = vector.broadcast %c0_i32_20 : i32 to vector<1x256xi32>
    %47 = arith.cmpi sge, %45, %46 : vector<1x256xi32>
    %c0_i32_21 = arith.constant 0 : i32
    %48 = vector.broadcast %c0_i32_21 : i32 to vector<1x256xi32>
    %49 = arith.addi %25, %48 : vector<1x256xi32>
    %c16_i32_22 = arith.constant 16 : i32
    %50 = vector.broadcast %c16_i32_22 : i32 to vector<1x256xi32>
    %51 = arith.cmpi slt, %49, %50 : vector<1x256xi32>
    %52 = arith.andi %47, %51 : vector<1x256xi1>
    %c1_i32_23 = arith.constant 1 : i32
    %53 = vector.broadcast %c1_i32_23 : i32 to vector<1x256xi32>
    %54 = arith.addi %25, %53 : vector<1x256xi32>
    %c0_i32_24 = arith.constant 0 : i32
    %55 = vector.broadcast %c0_i32_24 : i32 to vector<1x256xi32>
    %56 = arith.cmpi sge, %54, %55 : vector<1x256xi32>
    %c1_i32_25 = arith.constant 1 : i32
    %57 = vector.broadcast %c1_i32_25 : i32 to vector<1x256xi32>
    %58 = arith.addi %25, %57 : vector<1x256xi32>
    %c16_i32_26 = arith.constant 16 : i32
    %59 = vector.broadcast %c16_i32_26 : i32 to vector<1x256xi32>
    %60 = arith.cmpi slt, %58, %59 : vector<1x256xi32>
    %61 = arith.andi %56, %60 : vector<1x256xi1>
    %c2_i32 = arith.constant 2 : i32
    %62 = vector.broadcast %c2_i32 : i32 to vector<1x256xi32>
    %63 = arith.addi %25, %62 : vector<1x256xi32>
    %c0_i32_27 = arith.constant 0 : i32
    %64 = vector.broadcast %c0_i32_27 : i32 to vector<1x256xi32>
    %65 = arith.cmpi sge, %63, %64 : vector<1x256xi32>
    %c2_i32_28 = arith.constant 2 : i32
    %66 = vector.broadcast %c2_i32_28 : i32 to vector<1x256xi32>
    %67 = arith.addi %25, %66 : vector<1x256xi32>
    %c16_i32_29 = arith.constant 16 : i32
    %68 = vector.broadcast %c16_i32_29 : i32 to vector<1x256xi32>
    %69 = arith.cmpi slt, %67, %68 : vector<1x256xi32>
    %70 = arith.andi %65, %69 : vector<1x256xi1>
    %c0_30 = arith.constant 0 : index
    %c0_31 = arith.constant 0 : index
    %71 = vector.load %arg4[%c0_30, %c0_31] : memref<8x324xf32, #tpu.memory_space<vmem>>, vector<8x256xf32>
    %72 = arith.mulf %1, %71 : vector<8x256xf32>
    %cst_32 = arith.constant dense<0.000000e+00> : vector<256xf32>
    %73 = vector.multi_reduction <add>, %72, %cst_32 [0] : vector<8x256xf32> to vector<256xf32>
    %74 = vector.shape_cast %73 : vector<256xf32> to vector<1x256xf32>
    %cst_33 = arith.constant 0.000000e+00 : f32
    %75 = vector.broadcast %cst_33 : f32 to vector<1x256xf32>
    %76 = arith.select %34, %74, %75 : vector<1x256xi1>, vector<1x256xf32>
    %c0_34 = arith.constant 0 : index
    %c0_35 = arith.constant 0 : index
    %c0_36 = arith.constant 0 : index
    %77 = vector.load %arg3[%c0_34, %c0_35, %c0_36] : memref<1x25x256xf32, #tpu.memory_space<vmem>>, vector<1x1x256xf32>
    %78 = vector.shape_cast %77 : vector<1x1x256xf32> to vector<1x256xf32>
    %79 = vector.shape_cast %76 : vector<1x256xf32> to vector<1x1x256xf32>
    tpu.vector_store %arg3[%c0_34, %c0_35, %c0_36], %79 {strides = array<i32>} : memref<1x25x256xf32, #tpu.memory_space<vmem>>, vector<1x1x256xf32>,
    %c0_37 = arith.constant 0 : index
    %c1 = arith.constant 1 : index
    %80 = vector.load %arg4[%c0_37, %c1] : memref<8x324xf32, #tpu.memory_space<vmem>>, vector<8x256xf32>
    %81 = arith.mulf %1, %80 : vector<8x256xf32>
    %cst_38 = arith.constant dense<0.000000e+00> : vector<256xf32>
    %82 = vector.multi_reduction <add>, %81, %cst_38 [0] : vector<8x256xf32> to vector<256xf32>
    %83 = vector.shape_cast %82 : vector<256xf32> to vector<1x256xf32>
    %cst_39 = arith.constant 0.000000e+00 : f32
    %84 = vector.broadcast %cst_39 : f32 to vector<1x256xf32>
    %85 = arith.select %43, %83, %84 : vector<1x256xi1>, vector<1x256xf32>
    %c0_40 = arith.constant 0 : index
    %c1_41 = arith.constant 1 : index
    %c0_42 = arith.constant 0 : index
    %86 = vector.load %arg3[%c0_40, %c1_41, %c0_42] : memref<1x25x256xf32, #tpu.memory_space<vmem>>, vector<1x1x256xf32>
    %87 = vector.shape_cast %86 : vector<1x1x256xf32> to vector<1x256xf32>
    %88 = vector.shape_cast %85 : vector<1x256xf32> to vector<1x1x256xf32>
    tpu.vector_store %arg3[%c0_40, %c1_41, %c0_42], %88 {strides = array<i32>} : memref<1x25x256xf32, #tpu.memory_space<vmem>>, vector<1x1x256xf32>,
    %c0_43 = arith.constant 0 : index
    %c2 = arith.constant 2 : index
    %89 = vector.load %arg4[%c0_43, %c2] : memref<8x324xf32, #tpu.memory_space<vmem>>, vector<8x256xf32>
    %90 = arith.mulf %1, %89 : vector<8x256xf32>
    %cst_44 = arith.constant dense<0.000000e+00> : vector<256xf32>
    %91 = vector.multi_reduction <add>, %90, %cst_44 [0] : vector<8x256xf32> to vector<256xf32>
    %92 = vector.shape_cast %91 : vector<256xf32> to vector<1x256xf32>
    %cst_45 = arith.constant 0.000000e+00 : f32
    %93 = vector.broadcast %cst_45 : f32 to vector<1x256xf32>
    %94 = arith.select %52, %92, %93 : vector<1x256xi1>, vector<1x256xf32>
    %c0_46 = arith.constant 0 : index
    %c2_47 = arith.constant 2 : index
    %c0_48 = arith.constant 0 : index
    %95 = vector.load %arg3[%c0_46, %c2_47, %c0_48] : memref<1x25x256xf32, #tpu.memory_space<vmem>>, vector<1x1x256xf32>
    %96 = vector.shape_cast %95 : vector<1x1x256xf32> to vector<1x256xf32>
    %97 = vector.shape_cast %94 : vector<1x256xf32> to vector<1x1x256xf32>
    tpu.vector_store %arg3[%c0_46, %c2_47, %c0_48], %97 {strides = array<i32>} : memref<1x25x256xf32, #tpu.memory_space<vmem>>, vector<1x1x256xf32>,
    %c0_49 = arith.constant 0 : index
    %c3 = arith.constant 3 : index
    %98 = vector.load %arg4[%c0_49, %c3] : memref<8x324xf32, #tpu.memory_space<vmem>>, vector<8x256xf32>
    %99 = arith.mulf %1, %98 : vector<8x256xf32>
    %cst_50 = arith.constant dense<0.000000e+00> : vector<256xf32>
    %100 = vector.multi_reduction <add>, %99, %cst_50 [0] : vector<8x256xf32> to vector<256xf32>
    %101 = vector.shape_cast %100 : vector<256xf32> to vector<1x256xf32>
    %cst_51 = arith.constant 0.000000e+00 : f32
    %102 = vector.broadcast %cst_51 : f32 to vector<1x256xf32>
    %103 = arith.select %61, %101, %102 : vector<1x256xi1>, vector<1x256xf32>
    %c0_52 = arith.constant 0 : index
    %c3_53 = arith.constant 3 : index
    %c0_54 = arith.constant 0 : index
    %104 = vector.load %arg3[%c0_52, %c3_53, %c0_54] : memref<1x25x256xf32, #tpu.memory_space<vmem>>, vector<1x1x256xf32>
    %105 = vector.shape_cast %104 : vector<1x1x256xf32> to vector<1x256xf32>
    %106 = vector.shape_cast %103 : vector<1x256xf32> to vector<1x1x256xf32>
    tpu.vector_store %arg3[%c0_52, %c3_53, %c0_54], %106 {strides = array<i32>} : memref<1x25x256xf32, #tpu.memory_space<vmem>>, vector<1x1x256xf32>,
    %c0_55 = arith.constant 0 : index
    %c4 = arith.constant 4 : index
    %107 = vector.load %arg4[%c0_55, %c4] : memref<8x324xf32, #tpu.memory_space<vmem>>, vector<8x256xf32>
    %108 = arith.mulf %1, %107 : vector<8x256xf32>
    %cst_56 = arith.constant dense<0.000000e+00> : vector<256xf32>
    %109 = vector.multi_reduction <add>, %108, %cst_56 [0] : vector<8x256xf32> to vector<256xf32>
    %110 = vector.shape_cast %109 : vector<256xf32> to vector<1x256xf32>
    %cst_57 = arith.constant 0.000000e+00 : f32
    %111 = vector.broadcast %cst_57 : f32 to vector<1x256xf32>
    %112 = arith.select %70, %110, %111 : vector<1x256xi1>, vector<1x256xf32>
    %c0_58 = arith.constant 0 : index
    %c4_59 = arith.constant 4 : index
    %c0_60 = arith.constant 0 : index
    %113 = vector.load %arg3[%c0_58, %c4_59, %c0_60] : memref<1x25x256xf32, #tpu.memory_space<vmem>>, vector<1x1x256xf32>
    %114 = vector.shape_cast %113 : vector<1x1x256xf32> to vector<1x256xf32>
    %115 = vector.shape_cast %112 : vector<1x256xf32> to vector<1x1x256xf32>
    tpu.vector_store %arg3[%c0_58, %c4_59, %c0_60], %115 {strides = array<i32>} : memref<1x25x256xf32, #tpu.memory_space<vmem>>, vector<1x1x256xf32>,
    %c0_61 = arith.constant 0 : index
    %c16 = arith.constant 16 : index
    %116 = vector.load %arg4[%c0_61, %c16] : memref<8x324xf32, #tpu.memory_space<vmem>>, vector<8x256xf32>
    %117 = arith.mulf %1, %116 : vector<8x256xf32>
    %cst_62 = arith.constant dense<0.000000e+00> : vector<256xf32>
    %118 = vector.multi_reduction <add>, %117, %cst_62 [0] : vector<8x256xf32> to vector<256xf32>
    %119 = vector.shape_cast %118 : vector<256xf32> to vector<1x256xf32>
    %cst_63 = arith.constant 0.000000e+00 : f32
    %120 = vector.broadcast %cst_63 : f32 to vector<1x256xf32>
    %121 = arith.select %34, %119, %120 : vector<1x256xi1>, vector<1x256xf32>
    %c0_64 = arith.constant 0 : index
    %c5 = arith.constant 5 : index
    %c0_65 = arith.constant 0 : index
    %122 = vector.load %arg3[%c0_64, %c5, %c0_65] : memref<1x25x256xf32, #tpu.memory_space<vmem>>, vector<1x1x256xf32>
    %123 = vector.shape_cast %122 : vector<1x1x256xf32> to vector<1x256xf32>
    %124 = vector.shape_cast %121 : vector<1x256xf32> to vector<1x1x256xf32>
    tpu.vector_store %arg3[%c0_64, %c5, %c0_65], %124 {strides = array<i32>} : memref<1x25x256xf32, #tpu.memory_space<vmem>>, vector<1x1x256xf32>,
    %c0_66 = arith.constant 0 : index
    %c17 = arith.constant 17 : index
    %125 = vector.load %arg4[%c0_66, %c17] : memref<8x324xf32, #tpu.memory_space<vmem>>, vector<8x256xf32>
    %126 = arith.mulf %1, %125 : vector<8x256xf32>
    %cst_67 = arith.constant dense<0.000000e+00> : vector<256xf32>
    %127 = vector.multi_reduction <add>, %126, %cst_67 [0] : vector<8x256xf32> to vector<256xf32>
    %128 = vector.shape_cast %127 : vector<256xf32> to vector<1x256xf32>
    %cst_68 = arith.constant 0.000000e+00 : f32
    %129 = vector.broadcast %cst_68 : f32 to vector<1x256xf32>
    %130 = arith.select %43, %128, %129 : vector<1x256xi1>, vector<1x256xf32>
    %c0_69 = arith.constant 0 : index
    %c6 = arith.constant 6 : index
    %c0_70 = arith.constant 0 : index
    %131 = vector.load %arg3[%c0_69, %c6, %c0_70] : memref<1x25x256xf32, #tpu.memory_space<vmem>>, vector<1x1x256xf32>
    %132 = vector.shape_cast %131 : vector<1x1x256xf32> to vector<1x256xf32>
    %133 = vector.shape_cast %130 : vector<1x256xf32> to vector<1x1x256xf32>
    tpu.vector_store %arg3[%c0_69, %c6, %c0_70], %133 {strides = array<i32>} : memref<1x25x256xf32, #tpu.memory_space<vmem>>, vector<1x1x256xf32>,
    %c0_71 = arith.constant 0 : index
    %c18 = arith.constant 18 : index
    %134 = vector.load %arg4[%c0_71, %c18] : memref<8x324xf32, #tpu.memory_space<vmem>>, vector<8x256xf32>
    %135 = arith.mulf %1, %134 : vector<8x256xf32>
    %cst_72 = arith.constant dense<0.000000e+00> : vector<256xf32>
    %136 = vector.multi_reduction <add>, %135, %cst_72 [0] : vector<8x256xf32> to vector<256xf32>
    %137 = vector.shape_cast %136 : vector<256xf32> to vector<1x256xf32>
    %cst_73 = arith.constant 0.000000e+00 : f32
    %138 = vector.broadcast %cst_73 : f32 to vector<1x256xf32>
    %139 = arith.select %52, %137, %138 : vector<1x256xi1>, vector<1x256xf32>
    %c0_74 = arith.constant 0 : index
    %c7 = arith.constant 7 : index
    %c0_75 = arith.constant 0 : index
    %140 = vector.load %arg3[%c0_74, %c7, %c0_75] : memref<1x25x256xf32, #tpu.memory_space<vmem>>, vector<1x1x256xf32>
    %141 = vector.shape_cast %140 : vector<1x1x256xf32> to vector<1x256xf32>
    %142 = vector.shape_cast %139 : vector<1x256xf32> to vector<1x1x256xf32>
    tpu.vector_store %arg3[%c0_74, %c7, %c0_75], %142 {strides = array<i32>} : memref<1x25x256xf32, #tpu.memory_space<vmem>>, vector<1x1x256xf32>,
    %c0_76 = arith.constant 0 : index
    %c19 = arith.constant 19 : index
    %143 = vector.load %arg4[%c0_76, %c19] : memref<8x324xf32, #tpu.memory_space<vmem>>, vector<8x256xf32>
    %144 = arith.mulf %1, %143 : vector<8x256xf32>
    %cst_77 = arith.constant dense<0.000000e+00> : vector<256xf32>
    %145 = vector.multi_reduction <add>, %144, %cst_77 [0] : vector<8x256xf32> to vector<256xf32>
    %146 = vector.shape_cast %145 : vector<256xf32> to vector<1x256xf32>
    %cst_78 = arith.constant 0.000000e+00 : f32
    %147 = vector.broadcast %cst_78 : f32 to vector<1x256xf32>
    %148 = arith.select %61, %146, %147 : vector<1x256xi1>, vector<1x256xf32>
    %c0_79 = arith.constant 0 : index
    %c8 = arith.constant 8 : index
    %c0_80 = arith.constant 0 : index
    %149 = vector.load %arg3[%c0_79, %c8, %c0_80] : memref<1x25x256xf32, #tpu.memory_space<vmem>>, vector<1x1x256xf32>
    %150 = vector.shape_cast %149 : vector<1x1x256xf32> to vector<1x256xf32>
    %151 = vector.shape_cast %148 : vector<1x256xf32> to vector<1x1x256xf32>
    tpu.vector_store %arg3[%c0_79, %c8, %c0_80], %151 {strides = array<i32>} : memref<1x25x256xf32, #tpu.memory_space<vmem>>, vector<1x1x256xf32>,
    %c0_81 = arith.constant 0 : index
    %c20 = arith.constant 20 : index
    %152 = vector.load %arg4[%c0_81, %c20] : memref<8x324xf32, #tpu.memory_space<vmem>>, vector<8x256xf32>
    %153 = arith.mulf %1, %152 : vector<8x256xf32>
    %cst_82 = arith.constant dense<0.000000e+00> : vector<256xf32>
    %154 = vector.multi_reduction <add>, %153, %cst_82 [0] : vector<8x256xf32> to vector<256xf32>
    %155 = vector.shape_cast %154 : vector<256xf32> to vector<1x256xf32>
    %cst_83 = arith.constant 0.000000e+00 : f32
    %156 = vector.broadcast %cst_83 : f32 to vector<1x256xf32>
    %157 = arith.select %70, %155, %156 : vector<1x256xi1>, vector<1x256xf32>
    %c0_84 = arith.constant 0 : index
    %c9 = arith.constant 9 : index
    %c0_85 = arith.constant 0 : index
    %158 = vector.load %arg3[%c0_84, %c9, %c0_85] : memref<1x25x256xf32, #tpu.memory_space<vmem>>, vector<1x1x256xf32>
    %159 = vector.shape_cast %158 : vector<1x1x256xf32> to vector<1x256xf32>
    %160 = vector.shape_cast %157 : vector<1x256xf32> to vector<1x1x256xf32>
    tpu.vector_store %arg3[%c0_84, %c9, %c0_85], %160 {strides = array<i32>} : memref<1x25x256xf32, #tpu.memory_space<vmem>>, vector<1x1x256xf32>,
    %c0_86 = arith.constant 0 : index
    %c32 = arith.constant 32 : index
    %161 = vector.load %arg4[%c0_86, %c32] : memref<8x324xf32, #tpu.memory_space<vmem>>, vector<8x256xf32>
    %162 = arith.mulf %1, %161 : vector<8x256xf32>
    %cst_87 = arith.constant dense<0.000000e+00> : vector<256xf32>
    %163 = vector.multi_reduction <add>, %162, %cst_87 [0] : vector<8x256xf32> to vector<256xf32>
    %164 = vector.shape_cast %163 : vector<256xf32> to vector<1x256xf32>
    %cst_88 = arith.constant 0.000000e+00 : f32
    %165 = vector.broadcast %cst_88 : f32 to vector<1x256xf32>
    %166 = arith.select %34, %164, %165 : vector<1x256xi1>, vector<1x256xf32>
    %c0_89 = arith.constant 0 : index
    %c10 = arith.constant 10 : index
    %c0_90 = arith.constant 0 : index
    %167 = vector.load %arg3[%c0_89, %c10, %c0_90] : memref<1x25x256xf32, #tpu.memory_space<vmem>>, vector<1x1x256xf32>
    %168 = vector.shape_cast %167 : vector<1x1x256xf32> to vector<1x256xf32>
    %169 = vector.shape_cast %166 : vector<1x256xf32> to vector<1x1x256xf32>
    tpu.vector_store %arg3[%c0_89, %c10, %c0_90], %169 {strides = array<i32>} : memref<1x25x256xf32, #tpu.memory_space<vmem>>, vector<1x1x256xf32>,
    %c0_91 = arith.constant 0 : index
    %c33 = arith.constant 33 : index
    %170 = vector.load %arg4[%c0_91, %c33] : memref<8x324xf32, #tpu.memory_space<vmem>>, vector<8x256xf32>
    %171 = arith.mulf %1, %170 : vector<8x256xf32>
    %cst_92 = arith.constant dense<0.000000e+00> : vector<256xf32>
    %172 = vector.multi_reduction <add>, %171, %cst_92 [0] : vector<8x256xf32> to vector<256xf32>
    %173 = vector.shape_cast %172 : vector<256xf32> to vector<1x256xf32>
    %cst_93 = arith.constant 0.000000e+00 : f32
    %174 = vector.broadcast %cst_93 : f32 to vector<1x256xf32>
    %175 = arith.select %43, %173, %174 : vector<1x256xi1>, vector<1x256xf32>
    %c0_94 = arith.constant 0 : index
    %c11 = arith.constant 11 : index
    %c0_95 = arith.constant 0 : index
    %176 = vector.load %arg3[%c0_94, %c11, %c0_95] : memref<1x25x256xf32, #tpu.memory_space<vmem>>, vector<1x1x256xf32>
    %177 = vector.shape_cast %176 : vector<1x1x256xf32> to vector<1x256xf32>
    %178 = vector.shape_cast %175 : vector<1x256xf32> to vector<1x1x256xf32>
    tpu.vector_store %arg3[%c0_94, %c11, %c0_95], %178 {strides = array<i32>} : memref<1x25x256xf32, #tpu.memory_space<vmem>>, vector<1x1x256xf32>,
    %c0_96 = arith.constant 0 : index
    %c34_97 = arith.constant 34 : index
    %179 = vector.load %arg4[%c0_96, %c34_97] : memref<8x324xf32, #tpu.memory_space<vmem>>, vector<8x256xf32>
    %180 = arith.mulf %1, %179 : vector<8x256xf32>
    %cst_98 = arith.constant dense<0.000000e+00> : vector<256xf32>
    %181 = vector.multi_reduction <add>, %180, %cst_98 [0] : vector<8x256xf32> to vector<256xf32>
    %182 = vector.shape_cast %181 : vector<256xf32> to vector<1x256xf32>
    %cst_99 = arith.constant 0.000000e+00 : f32
    %183 = vector.broadcast %cst_99 : f32 to vector<1x256xf32>
    %184 = arith.select %52, %182, %183 : vector<1x256xi1>, vector<1x256xf32>
    %c0_100 = arith.constant 0 : index
    %c12 = arith.constant 12 : index
    %c0_101 = arith.constant 0 : index
    %185 = vector.load %arg3[%c0_100, %c12, %c0_101] : memref<1x25x256xf32, #tpu.memory_space<vmem>>, vector<1x1x256xf32>
    %186 = vector.shape_cast %185 : vector<1x1x256xf32> to vector<1x256xf32>
    %187 = vector.shape_cast %184 : vector<1x256xf32> to vector<1x1x256xf32>
    tpu.vector_store %arg3[%c0_100, %c12, %c0_101], %187 {strides = array<i32>} : memref<1x25x256xf32, #tpu.memory_space<vmem>>, vector<1x1x256xf32>,
    %c0_102 = arith.constant 0 : index
    %c35 = arith.constant 35 : index
    %188 = vector.load %arg4[%c0_102, %c35] : memref<8x324xf32, #tpu.memory_space<vmem>>, vector<8x256xf32>
    %189 = arith.mulf %1, %188 : vector<8x256xf32>
    %cst_103 = arith.constant dense<0.000000e+00> : vector<256xf32>
    %190 = vector.multi_reduction <add>, %189, %cst_103 [0] : vector<8x256xf32> to vector<256xf32>
    %191 = vector.shape_cast %190 : vector<256xf32> to vector<1x256xf32>
    %cst_104 = arith.constant 0.000000e+00 : f32
    %192 = vector.broadcast %cst_104 : f32 to vector<1x256xf32>
    %193 = arith.select %61, %191, %192 : vector<1x256xi1>, vector<1x256xf32>
    %c0_105 = arith.constant 0 : index
    %c13 = arith.constant 13 : index
    %c0_106 = arith.constant 0 : index
    %194 = vector.load %arg3[%c0_105, %c13, %c0_106] : memref<1x25x256xf32, #tpu.memory_space<vmem>>, vector<1x1x256xf32>
    %195 = vector.shape_cast %194 : vector<1x1x256xf32> to vector<1x256xf32>
    %196 = vector.shape_cast %193 : vector<1x256xf32> to vector<1x1x256xf32>
    tpu.vector_store %arg3[%c0_105, %c13, %c0_106], %196 {strides = array<i32>} : memref<1x25x256xf32, #tpu.memory_space<vmem>>, vector<1x1x256xf32>,
    %c0_107 = arith.constant 0 : index
    %c36 = arith.constant 36 : index
    %197 = vector.load %arg4[%c0_107, %c36] : memref<8x324xf32, #tpu.memory_space<vmem>>, vector<8x256xf32>
    %198 = arith.mulf %1, %197 : vector<8x256xf32>
    %cst_108 = arith.constant dense<0.000000e+00> : vector<256xf32>
    %199 = vector.multi_reduction <add>, %198, %cst_108 [0] : vector<8x256xf32> to vector<256xf32>
    %200 = vector.shape_cast %199 : vector<256xf32> to vector<1x256xf32>
    %cst_109 = arith.constant 0.000000e+00 : f32
    %201 = vector.broadcast %cst_109 : f32 to vector<1x256xf32>
    %202 = arith.select %70, %200, %201 : vector<1x256xi1>, vector<1x256xf32>
    %c0_110 = arith.constant 0 : index
    %c14 = arith.constant 14 : index
    %c0_111 = arith.constant 0 : index
    %203 = vector.load %arg3[%c0_110, %c14, %c0_111] : memref<1x25x256xf32, #tpu.memory_space<vmem>>, vector<1x1x256xf32>
    %204 = vector.shape_cast %203 : vector<1x1x256xf32> to vector<1x256xf32>
    %205 = vector.shape_cast %202 : vector<1x256xf32> to vector<1x1x256xf32>
    tpu.vector_store %arg3[%c0_110, %c14, %c0_111], %205 {strides = array<i32>} : memref<1x25x256xf32, #tpu.memory_space<vmem>>, vector<1x1x256xf32>,
    %c0_112 = arith.constant 0 : index
    %c48 = arith.constant 48 : index
    %206 = vector.load %arg4[%c0_112, %c48] : memref<8x324xf32, #tpu.memory_space<vmem>>, vector<8x256xf32>
    %207 = arith.mulf %1, %206 : vector<8x256xf32>
    %cst_113 = arith.constant dense<0.000000e+00> : vector<256xf32>
    %208 = vector.multi_reduction <add>, %207, %cst_113 [0] : vector<8x256xf32> to vector<256xf32>
    %209 = vector.shape_cast %208 : vector<256xf32> to vector<1x256xf32>
    %cst_114 = arith.constant 0.000000e+00 : f32
    %210 = vector.broadcast %cst_114 : f32 to vector<1x256xf32>
    %211 = arith.select %34, %209, %210 : vector<1x256xi1>, vector<1x256xf32>
    %c0_115 = arith.constant 0 : index
    %c15 = arith.constant 15 : index
    %c0_116 = arith.constant 0 : index
    %212 = vector.load %arg3[%c0_115, %c15, %c0_116] : memref<1x25x256xf32, #tpu.memory_space<vmem>>, vector<1x1x256xf32>
    %213 = vector.shape_cast %212 : vector<1x1x256xf32> to vector<1x256xf32>
    %214 = vector.shape_cast %211 : vector<1x256xf32> to vector<1x1x256xf32>
    tpu.vector_store %arg3[%c0_115, %c15, %c0_116], %214 {strides = array<i32>} : memref<1x25x256xf32, #tpu.memory_space<vmem>>, vector<1x1x256xf32>,
    %c0_117 = arith.constant 0 : index
    %c49 = arith.constant 49 : index
    %215 = vector.load %arg4[%c0_117, %c49] : memref<8x324xf32, #tpu.memory_space<vmem>>, vector<8x256xf32>
    %216 = arith.mulf %1, %215 : vector<8x256xf32>
    %cst_118 = arith.constant dense<0.000000e+00> : vector<256xf32>
    %217 = vector.multi_reduction <add>, %216, %cst_118 [0] : vector<8x256xf32> to vector<256xf32>
    %218 = vector.shape_cast %217 : vector<256xf32> to vector<1x256xf32>
    %cst_119 = arith.constant 0.000000e+00 : f32
    %219 = vector.broadcast %cst_119 : f32 to vector<1x256xf32>
    %220 = arith.select %43, %218, %219 : vector<1x256xi1>, vector<1x256xf32>
    %c0_120 = arith.constant 0 : index
    %c16_121 = arith.constant 16 : index
    %c0_122 = arith.constant 0 : index
    %221 = vector.load %arg3[%c0_120, %c16_121, %c0_122] : memref<1x25x256xf32, #tpu.memory_space<vmem>>, vector<1x1x256xf32>
    %222 = vector.shape_cast %221 : vector<1x1x256xf32> to vector<1x256xf32>
    %223 = vector.shape_cast %220 : vector<1x256xf32> to vector<1x1x256xf32>
    tpu.vector_store %arg3[%c0_120, %c16_121, %c0_122], %223 {strides = array<i32>} : memref<1x25x256xf32, #tpu.memory_space<vmem>>, vector<1x1x256xf32>,
    %c0_123 = arith.constant 0 : index
    %c50 = arith.constant 50 : index
    %224 = vector.load %arg4[%c0_123, %c50] : memref<8x324xf32, #tpu.memory_space<vmem>>, vector<8x256xf32>
    %225 = arith.mulf %1, %224 : vector<8x256xf32>
    %cst_124 = arith.constant dense<0.000000e+00> : vector<256xf32>
    %226 = vector.multi_reduction <add>, %225, %cst_124 [0] : vector<8x256xf32> to vector<256xf32>
    %227 = vector.shape_cast %226 : vector<256xf32> to vector<1x256xf32>
    %cst_125 = arith.constant 0.000000e+00 : f32
    %228 = vector.broadcast %cst_125 : f32 to vector<1x256xf32>
    %229 = arith.select %52, %227, %228 : vector<1x256xi1>, vector<1x256xf32>
    %c0_126 = arith.constant 0 : index
    %c17_127 = arith.constant 17 : index
    %c0_128 = arith.constant 0 : index
    %230 = vector.load %arg3[%c0_126, %c17_127, %c0_128] : memref<1x25x256xf32, #tpu.memory_space<vmem>>, vector<1x1x256xf32>
    %231 = vector.shape_cast %230 : vector<1x1x256xf32> to vector<1x256xf32>
    %232 = vector.shape_cast %229 : vector<1x256xf32> to vector<1x1x256xf32>
    tpu.vector_store %arg3[%c0_126, %c17_127, %c0_128], %232 {strides = array<i32>} : memref<1x25x256xf32, #tpu.memory_space<vmem>>, vector<1x1x256xf32>,
    %c0_129 = arith.constant 0 : index
    %c51 = arith.constant 51 : index
    %233 = vector.load %arg4[%c0_129, %c51] : memref<8x324xf32, #tpu.memory_space<vmem>>, vector<8x256xf32>
    %234 = arith.mulf %1, %233 : vector<8x256xf32>
    %cst_130 = arith.constant dense<0.000000e+00> : vector<256xf32>
    %235 = vector.multi_reduction <add>, %234, %cst_130 [0] : vector<8x256xf32> to vector<256xf32>
    %236 = vector.shape_cast %235 : vector<256xf32> to vector<1x256xf32>
    %cst_131 = arith.constant 0.000000e+00 : f32
    %237 = vector.broadcast %cst_131 : f32 to vector<1x256xf32>
    %238 = arith.select %61, %236, %237 : vector<1x256xi1>, vector<1x256xf32>
    %c0_132 = arith.constant 0 : index
    %c18_133 = arith.constant 18 : index
    %c0_134 = arith.constant 0 : index
    %239 = vector.load %arg3[%c0_132, %c18_133, %c0_134] : memref<1x25x256xf32, #tpu.memory_space<vmem>>, vector<1x1x256xf32>
    %240 = vector.shape_cast %239 : vector<1x1x256xf32> to vector<1x256xf32>
    %241 = vector.shape_cast %238 : vector<1x256xf32> to vector<1x1x256xf32>
    tpu.vector_store %arg3[%c0_132, %c18_133, %c0_134], %241 {strides = array<i32>} : memref<1x25x256xf32, #tpu.memory_space<vmem>>, vector<1x1x256xf32>,
    %c0_135 = arith.constant 0 : index
    %c52 = arith.constant 52 : index
    %242 = vector.load %arg4[%c0_135, %c52] : memref<8x324xf32, #tpu.memory_space<vmem>>, vector<8x256xf32>
    %243 = arith.mulf %1, %242 : vector<8x256xf32>
    %cst_136 = arith.constant dense<0.000000e+00> : vector<256xf32>
    %244 = vector.multi_reduction <add>, %243, %cst_136 [0] : vector<8x256xf32> to vector<256xf32>
    %245 = vector.shape_cast %244 : vector<256xf32> to vector<1x256xf32>
    %cst_137 = arith.constant 0.000000e+00 : f32
    %246 = vector.broadcast %cst_137 : f32 to vector<1x256xf32>
    %247 = arith.select %70, %245, %246 : vector<1x256xi1>, vector<1x256xf32>
    %c0_138 = arith.constant 0 : index
    %c19_139 = arith.constant 19 : index
    %c0_140 = arith.constant 0 : index
    %248 = vector.load %arg3[%c0_138, %c19_139, %c0_140] : memref<1x25x256xf32, #tpu.memory_space<vmem>>, vector<1x1x256xf32>
    %249 = vector.shape_cast %248 : vector<1x1x256xf32> to vector<1x256xf32>
    %250 = vector.shape_cast %247 : vector<1x256xf32> to vector<1x1x256xf32>
    tpu.vector_store %arg3[%c0_138, %c19_139, %c0_140], %250 {strides = array<i32>} : memref<1x25x256xf32, #tpu.memory_space<vmem>>, vector<1x1x256xf32>,
    %c0_141 = arith.constant 0 : index
    %c64 = arith.constant 64 : index
    %251 = vector.load %arg4[%c0_141, %c64] : memref<8x324xf32, #tpu.memory_space<vmem>>, vector<8x256xf32>
    %252 = arith.mulf %1, %251 : vector<8x256xf32>
    %cst_142 = arith.constant dense<0.000000e+00> : vector<256xf32>
    %253 = vector.multi_reduction <add>, %252, %cst_142 [0] : vector<8x256xf32> to vector<256xf32>
    %254 = vector.shape_cast %253 : vector<256xf32> to vector<1x256xf32>
    %cst_143 = arith.constant 0.000000e+00 : f32
    %255 = vector.broadcast %cst_143 : f32 to vector<1x256xf32>
    %256 = arith.select %34, %254, %255 : vector<1x256xi1>, vector<1x256xf32>
    %c0_144 = arith.constant 0 : index
    %c20_145 = arith.constant 20 : index
    %c0_146 = arith.constant 0 : index
    %257 = vector.load %arg3[%c0_144, %c20_145, %c0_146] : memref<1x25x256xf32, #tpu.memory_space<vmem>>, vector<1x1x256xf32>
    %258 = vector.shape_cast %257 : vector<1x1x256xf32> to vector<1x256xf32>
    %259 = vector.shape_cast %256 : vector<1x256xf32> to vector<1x1x256xf32>
    tpu.vector_store %arg3[%c0_144, %c20_145, %c0_146], %259 {strides = array<i32>} : memref<1x25x256xf32, #tpu.memory_space<vmem>>, vector<1x1x256xf32>,
    %c0_147 = arith.constant 0 : index
    %c65 = arith.constant 65 : index
    %260 = vector.load %arg4[%c0_147, %c65] : memref<8x324xf32, #tpu.memory_space<vmem>>, vector<8x256xf32>
    %261 = arith.mulf %1, %260 : vector<8x256xf32>
    %cst_148 = arith.constant dense<0.000000e+00> : vector<256xf32>
    %262 = vector.multi_reduction <add>, %261, %cst_148 [0] : vector<8x256xf32> to vector<256xf32>
    %263 = vector.shape_cast %262 : vector<256xf32> to vector<1x256xf32>
    %cst_149 = arith.constant 0.000000e+00 : f32
    %264 = vector.broadcast %cst_149 : f32 to vector<1x256xf32>
    %265 = arith.select %43, %263, %264 : vector<1x256xi1>, vector<1x256xf32>
    %c0_150 = arith.constant 0 : index
    %c21 = arith.constant 21 : index
    %c0_151 = arith.constant 0 : index
    %266 = vector.load %arg3[%c0_150, %c21, %c0_151] : memref<1x25x256xf32, #tpu.memory_space<vmem>>, vector<1x1x256xf32>
    %267 = vector.shape_cast %266 : vector<1x1x256xf32> to vector<1x256xf32>
    %268 = vector.shape_cast %265 : vector<1x256xf32> to vector<1x1x256xf32>
    tpu.vector_store %arg3[%c0_150, %c21, %c0_151], %268 {strides = array<i32>} : memref<1x25x256xf32, #tpu.memory_space<vmem>>, vector<1x1x256xf32>,
    %c0_152 = arith.constant 0 : index
    %c66 = arith.constant 66 : index
    %269 = vector.load %arg4[%c0_152, %c66] : memref<8x324xf32, #tpu.memory_space<vmem>>, vector<8x256xf32>
    %270 = arith.mulf %1, %269 : vector<8x256xf32>
    %cst_153 = arith.constant dense<0.000000e+00> : vector<256xf32>
    %271 = vector.multi_reduction <add>, %270, %cst_153 [0] : vector<8x256xf32> to vector<256xf32>
    %272 = vector.shape_cast %271 : vector<256xf32> to vector<1x256xf32>
    %cst_154 = arith.constant 0.000000e+00 : f32
    %273 = vector.broadcast %cst_154 : f32 to vector<1x256xf32>
    %274 = arith.select %52, %272, %273 : vector<1x256xi1>, vector<1x256xf32>
    %c0_155 = arith.constant 0 : index
    %c22 = arith.constant 22 : index
    %c0_156 = arith.constant 0 : index
    %275 = vector.load %arg3[%c0_155, %c22, %c0_156] : memref<1x25x256xf32, #tpu.memory_space<vmem>>, vector<1x1x256xf32>
    %276 = vector.shape_cast %275 : vector<1x1x256xf32> to vector<1x256xf32>
    %277 = vector.shape_cast %274 : vector<1x256xf32> to vector<1x1x256xf32>
    tpu.vector_store %arg3[%c0_155, %c22, %c0_156], %277 {strides = array<i32>} : memref<1x25x256xf32, #tpu.memory_space<vmem>>, vector<1x1x256xf32>,
    %c0_157 = arith.constant 0 : index
    %c67 = arith.constant 67 : index
    %278 = vector.load %arg4[%c0_157, %c67] : memref<8x324xf32, #tpu.memory_space<vmem>>, vector<8x256xf32>
    %279 = arith.mulf %1, %278 : vector<8x256xf32>
    %cst_158 = arith.constant dense<0.000000e+00> : vector<256xf32>
    %280 = vector.multi_reduction <add>, %279, %cst_158 [0] : vector<8x256xf32> to vector<256xf32>
    %281 = vector.shape_cast %280 : vector<256xf32> to vector<1x256xf32>
    %cst_159 = arith.constant 0.000000e+00 : f32
    %282 = vector.broadcast %cst_159 : f32 to vector<1x256xf32>
    %283 = arith.select %61, %281, %282 : vector<1x256xi1>, vector<1x256xf32>
    %c0_160 = arith.constant 0 : index
    %c23 = arith.constant 23 : index
    %c0_161 = arith.constant 0 : index
    %284 = vector.load %arg3[%c0_160, %c23, %c0_161] : memref<1x25x256xf32, #tpu.memory_space<vmem>>, vector<1x1x256xf32>
    %285 = vector.shape_cast %284 : vector<1x1x256xf32> to vector<1x256xf32>
    %286 = vector.shape_cast %283 : vector<1x256xf32> to vector<1x1x256xf32>
    tpu.vector_store %arg3[%c0_160, %c23, %c0_161], %286 {strides = array<i32>} : memref<1x25x256xf32, #tpu.memory_space<vmem>>, vector<1x1x256xf32>,
    %c0_162 = arith.constant 0 : index
    %c68 = arith.constant 68 : index
    %287 = vector.load %arg4[%c0_162, %c68] : memref<8x324xf32, #tpu.memory_space<vmem>>, vector<8x256xf32>
    %288 = arith.mulf %1, %287 : vector<8x256xf32>
    %cst_163 = arith.constant dense<0.000000e+00> : vector<256xf32>
    %289 = vector.multi_reduction <add>, %288, %cst_163 [0] : vector<8x256xf32> to vector<256xf32>
    %290 = vector.shape_cast %289 : vector<256xf32> to vector<1x256xf32>
    %cst_164 = arith.constant 0.000000e+00 : f32
    %291 = vector.broadcast %cst_164 : f32 to vector<1x256xf32>
    %292 = arith.select %70, %290, %291 : vector<1x256xi1>, vector<1x256xf32>
    %c0_165 = arith.constant 0 : index
    %c24 = arith.constant 24 : index
    %c0_166 = arith.constant 0 : index
    %293 = vector.load %arg3[%c0_165, %c24, %c0_166] : memref<1x25x256xf32, #tpu.memory_space<vmem>>, vector<1x1x256xf32>
    %294 = vector.shape_cast %293 : vector<1x1x256xf32> to vector<1x256xf32>
    %295 = vector.shape_cast %292 : vector<1x256xf32> to vector<1x1x256xf32>
    tpu.vector_store %arg3[%c0_165, %c24, %c0_166], %295 {strides = array<i32>} : memref<1x25x256xf32, #tpu.memory_space<vmem>>, vector<1x1x256xf32>,
    return
  }
  func.func @transform_0(%arg0: i32) -> (i32, i32, i32) {
    %c0_i32 = arith.constant 0 : i32
    %c0_i32_0 = arith.constant 0 : i32
    %c0_i32_1 = arith.constant 0 : i32
    return %arg0, %c0_i32, %c0_i32_0 : i32, i32, i32
  }
  func.func @transform_1(%arg0: i32) -> (i32, i32, i32) {
    %c0_i32 = arith.constant 0 : i32
    %c0_i32_0 = arith.constant 0 : i32
    %c0_i32_1 = arith.constant 0 : i32
    return %arg0, %c0_i32, %c0_i32_0 : i32, i32, i32
  }
  func.func @transform_2(%arg0: i32) -> (i32, i32, i32) {
    %c0_i32 = arith.constant 0 : i32
    %c0_i32_0 = arith.constant 0 : i32
    %c0_i32_1 = arith.constant 0 : i32
    return %arg0, %c0_i32, %c0_i32_0 : i32, i32, i32
  }
}

</mosaic_0001>

<bundles_post_ra>
// kernel: tpu_custom_call.1
= control target key start
LH: loop header
LB: loop body
LE: loop exit
PB: predicated region body
PF: predicated region fallthrough
CT: control target
= control target key end

     0   :  { %7 = vsyncpa [#allocation4], 0  ;;  %s2242_s0 = inlined_call_operand.hbm [shape: f32[2,8,256], index: 0, kind: input, shape index: {}]   ;;  %s2243_s1 = inlined_call_operand.hbm [shape: f32[2,8,256], index: 1, kind: input, shape index: {}]   ;;  %s2244_s2 = inlined_call_operand.vmem [shape: f32[2,25,256], index: 2, kind: output, shape index: {}]  }
   0x1   :  { %9 = vsyncpa [#allocation4 + $0x1], 0 }
   0x2   :  { %10 = vsyncpa [#allocation6], 0 }
   0x3   :  { %12 = vsyncpa [#allocation6 + $0x1], 0  ;;  %s1651_s9 = smov 0   ;;  %s1653_s10 = smov 0  }
   0x4   :  { %s1655_s11 = smov 0   ;;  %s1657_s12 = smov 0  }
   0x5 LB: > { %s1670_s13 = sadd.s32 4294967295, %s1608_s12   ;;  %s1673_s14 = sadd.s32 1, %s1608_s12   ;;  %s1608_s12 = sphi %s1657_s12, %s2254_s12   ;;  %s1604_s11 = sphi %s1655_s11, %s2253_s11   ;;  %s1600_s10 = sphi %s1653_s10, %s2252_s10   ;;  %s1596_s9 = sphi %s1651_s9, %s2251_s9  }
   0x6   : > { %s22_s15 = ssub.s32 %s1608_s12, %s1673_s14  ;;  %s25_s16 = sadd.s32 1, %s1604_s11 }
   0x7   : > { %p23_p0 = scmp.eq.s32.totalorder %s22_s15, 0  ;;  %p32_p1 = scmp.ne.s32.totalorder %s1604_s11, %s1600_s10 }
   0x8   : > { %p33_p2 = scmp.eq.s32.totalorder %s1608_s12, 0  ;;  %p38_p3 = scmp.ne.s32.totalorder %s1600_s10, %s1596_s9 }
   0x9   : > { %s1683_s17 = scalar_select %p23_p0, %s1604_s11, %s25_s16  }
   0xa   : > { %p1685_p4 = por %p33_p2, %p32_p1  ;;  %p39_p5 = scmp.eq.s32.totalorder %s1670_s13, 0 }
   0xb   : > { %p1449_p6 = scmp.lt.s32.totalorder %s1608_s12, 2  ;;  %s1696_s20 = sand.u32 1, %s1604_s11  }
   0xc   : > { %p1691_p7 = por %p39_p5, %p38_p3  ;;  %s1398_s21 = sshll.u32 %s1696_s20, 4 }
   0xd   : > { %s1435_s22 = sshll.u32 %s1608_s12, 4  ;;  %s118_s26 = scalar_lea.vmem [#allocation3], %s1398_s21 }
   0xe   : > { %s123_s25 = scalar_lea.hbm %s2242_s0, %s1435_s22  ;;  %s127_s27 = sshll.u32 %s118_s26, 4  ;;  %s128_s27 = int_to_ptr.vmem [resolvable:$true] %s127_s27 }
   0xf   : > { %s125_s28 = sshll.u32 %s123_s25, 4  ;;  %p1705_p8 = pnand %p1449_p6, %p1685_p4  ;;  %s126_s28 = int_to_ptr.hbm [resolvable:$true] %s125_s28 }
  0x10   : > { %p1404_p9 = scmp.ge.s32.totalorder %s1608_s12, 1  ;;  %p152_p10 = scmp.lt.s32.totalorder %s1608_s12, 3 }
  0x11   : > { %s115_s30 = scalar_lea.sflag [#allocation4], %s1696_s20  ;;  %s1510_s3 = sshra.s32 %s126_s28, 4  ;;  %s1511_s3 = int_to_ptr.hbm [resolvable:$true] %s1510_s3 }
  0x12   : > { %s1512_s4 = scalar_lea.hbm %s1511_s3, 16  ;;  %p1514_p12 = pneg %p1705_p8 }
  0x13   : > { %p1513_p11 = scmp.ne.s32.totalorder %s1511_s3, %s1512_s4  ;;  %s1517_s7 = scalar_lea.hbm %s2242_s0, 32 }
  0x14   : > { %p1518_p1 = scmp.lt.s32.totalorder %s1511_s3, %s2242_s0  ;;  %p1519_p2 = scmp.lt.s32.totalorder %s1517_s7, %s1512_s4 }
  0x15   : > { %p1515_p13 = pnand %p1514_p12, %p1513_p11 }
  0x16   : > { %p1520_p3 = por %p1519_p2, %p1518_p1 }
  0x17   : > { %p1516_p0 = pneg %p1515_p13 }
  0x19   : > { %p1521_p4 = pnand %p1520_p3, %p1516_p0 }
  0x1b   : > { %1524 = shalt.err (!%p1521_p4)
}
  0x1c   : > { %1445 = dma.hbm_to_vmem [thread:$0]  (!%p1705_p8), %s126_s28, 256, %s128_s27, %s115_s30  }
  0x1d   : > { %p1729_p5 = pnand %p1404_p9, %p152_p10  ;;  %s143_s23 = scalar_lea.hbm %s2243_s1, %s1435_s22 }
  0x1e   : > { %s138_s24 = scalar_lea.vmem [#allocation5], %s1398_s21  ;;  %s145_s26 = sshll.u32 %s143_s23, 4  ;;  %s146_s26 = int_to_ptr.hbm [resolvable:$true] %s145_s26 }
  0x1f   : > { %s147_s25 = sshll.u32 %s138_s24, 4  ;;  %s135_s3 = scalar_lea.sflag [#allocation6], %s1696_s20  ;;  %s148_s25 = int_to_ptr.vmem [resolvable:$true] %s147_s25 }
  0x20   : > { %s1540_s4 = sshra.s32 %s146_s26, 4  ;;  %s1547_s28 = scalar_lea.hbm %s2243_s1, 32  ;;  %s1541_s4 = int_to_ptr.hbm [resolvable:$true] %s1540_s4 }
  0x21   : > { %s1542_s5 = scalar_lea.hbm %s1541_s4, 16  ;;  %p1548_p11 = scmp.lt.s32.totalorder %s1541_s4, %s2243_s1 }
  0x22   : > { %p1543_p6 = scmp.ne.s32.totalorder %s1541_s4, %s1542_s5  ;;  %p1549_p13 = scmp.lt.s32.totalorder %s1547_s28, %s1542_s5 }
  0x24   : > { %p1545_p9 = pnand %p1543_p6, %p1514_p12  ;;  %p1550_p0 = por %p1549_p13, %p1548_p11 }
  0x26   : > { %p1546_p10 = pneg %p1545_p9 }
  0x28   : > { %p1551_p1 = pnand %p1550_p0, %p1546_p10 }
  0x2a   : > { %1554 = shalt.err (!%p1551_p1)
}
  0x2b   : > { %1448 = dma.hbm_to_vmem [thread:$0]  (!%p1705_p8), %s146_s26, 256, %s148_s25, %s135_s3  }
  0x2c   : > { %156 = sbr.rel (%p1729_p5) target bundleno = 500 (0x1f4), region = 28  ;;  %s158_s20 = sand.u32 (!%p1729_p5), 1, %s1600_s10  }
  0x2d   : > { %s1405_s21 = sshll.u32 (!%p1729_p5), %s158_s20, 4  ;;  %s159_s6 = scalar_lea.sflag (!%p1729_p5), [#allocation4], %s158_s20 }
  0x2e   : > { %s1751_s7 = scalar_lea.vmem (!%p1729_p5), [#allocation3], %s1405_s21 }
  0x31   : > { %1587 = dma.done.wait (%p1691_p7), %s159_s6, 256  }
  0x32   : > { %1589 = vsyncadd (%p1691_p7), %s159_s6, 4294967040  ;;  %s169_s8 = scalar_lea.sflag [#allocation6], %s158_s20  ;;  %s172_s9 = scalar_lea.vmem [#allocation5], %s1405_s21 }
  0x33   : > { %1591 = dma.done.wait (%p1691_p7), %s169_s8, 256  }
  0x34   : > { %1593 = vsyncadd (%p1691_p7), %s169_s8, 4294967040  ;;  %vm208_vm0 = vcmask 277504   ;;  %v1610_v0 = vmov 0.0   ;;  %v206_v1 = vld [vmem:[%s172_s9] sm:$0xff]  ;;  %s1611_s29 = smov 34   ;;  %v207_v2 = vld [vmem:[%s172_s9 + $0x8] sm:$0xff]  ;;  %v226_v4 = vlaneseq }
  0x35   : > { %209 = vst.msk [vmem:[#allocation2] sm:$0xff] %vm208_vm0, %v1610_v0  ;;  %214 = vrot.lane.b32.xlu0 %v206_v1, %s1611_s29  ;;  %vm210_vm1 = vcmask 556304   ;;  %vm222_vm2 = vcmask 1047824   ;;  %v1763_v6 = vld [vmem:[%s1751_s7] sm:$0xff]  ;;  %v1766_v7 = vld [vmem:[%s1751_s7 + $0x8] sm:$0xff]  ;;  %s1612_s19 = smov 127  }
  0x36   : > { %211 = vst.msk [vmem:[#allocation2 + $0x10] sm:$0xff] %vm210_vm1, %v1610_v0  ;;  %v227_v5 = vand.u32 127, %v226_v4  ;;  %s1613_s15 = smov 126   ;;  %p199_p7 = scmp.lt.s32.totalorder %s1670_s13, 1  ;;  %vm312_vm5 = vcmask 1040384   ;;  %vm1813_vm6 = vcmp.lt.s32.totalorder %v226_v4, 256 }
  0x37   : > { %s1614_s16 = smov 125   ;;  %s1616_s26 = smov 112   ;;  %vm374_vm7 = vcmask 1031168   ;;  %vm415_vm8 = vcmask 1022976   ;;  %vm456_vm9 = vcmask 1014784   ;;  %vm497_vm10 = vcmask 916480  }
  0x38   : > { %v228_v11 = vadd.s32 128, %v227_v5  ;;  %v1785_v19 = vand.u32 15, %v227_v5  ;;  %s2256_s13 = smov (!%p199_p7, %s1670_s13), 1  ;;  %s1617_s3 = smov 111   ;;  %vm538_vm13 = vcmask 908288   ;;  %vm620_vm1 = vcmask 891904  }
  0x39   : > { %s1437_s18 = sshll.u32 %s2256_s13, 6  ;;  %s1615_s13 = smov 124  }
  0x3a   : > { %v1782_v16 = vand.u32 15, %v228_v11  ;;  %v1799_v26 = vadd.s32 4294967294, %v1785_v19  ;;  %s1811_s25 = scalar_lea.vmem %s2244_s2, %s1437_s18  ;;  %s1618_s4 = smov 110  }
  0x3b   : > { %s1619_s5 = smov 109   ;;  %s1620_s12 = smov 108  }
  0x3c   : > { %v1794_v23 = vadd.s32 4294967294, %v1782_v16  ;;  %vm255_vm4 = vcmp.ge.s32.totalorder %v1799_v26, 0  ;;  %s1621_s27 = smov 96   ;;  %s1622_s28 = smov 95  }
  0x3d   : > { %216 = vrot.lane.b32.xlu0 %v207_v2, %s1611_s29  ;;  %s1623_s30 = smov 94   ;;  %s1624_s22 = smov 93  }
  0x3e   : > { %vm256_vm3 = vcmp.ge.s32.totalorder %v1794_v23, 0  ;;  %s1625_s20 = smov 92   ;;  %s1626_s21 = smov 80  }
  0x3f   : > { %s1627_s6 = smov 79   ;;  %s1628_s8 = smov 78  }
  0x40   : > { %s1629_s9 = smov 77   ;;  %s1630_s29 = smov 76  }
  0x41   : > { %s1634_s18 = smov 62   ;;  %s1635_s23 = smov 60  }
  0xa7   : > { %v215_v3 = vpop.permute.xlu0 %214 }
  0xa8   : > { %223 = vst.msk [vmem:[#allocation2] sm:$0xff] %vm222_vm2, %v215_v3 }
  0xaf   : > { %v217_v8 = vpop.permute.xlu0 %216  ;;  %v1768_v9 = vld [vmem:[#allocation2] sm:$0xff] }
  0xb0   : > { %v1771_v10 = vsel %vm208_vm0, %v215_v3, %v217_v8  ;;  %225 = vst.msk [vmem:[#allocation2 + $0x10] sm:$0xff] %vm208_vm0, %v217_v8  ;;  %327 = vrot.lane.b32.xlu1 %v1768_v9, %s1612_s19  ;;  %v293_v12 = vmul.f32 %v1768_v9, %v1763_v6  ;;  %vm579_vm0 = vcmask 900096  }
  0xb1   : > { %370 = vrot.lane.b32.xlu0 %v1771_v10, %s1613_s15  ;;  %v294_v13 = vmul.f32 %v1771_v10, %v1766_v7 }
  0xb2   : > { %v295_v14 = vrot.slane %v293_v12, 4 }
  0xb3   : > { %v301_v15 = vrot.slane %v294_v13, 4 }
  0xb4   : > { %v296_v17 = vadd.f32 %v295_v14, %v293_v12 }
  0xb5   : > { %v302_v18 = vadd.f32 %v301_v15, %v294_v13 }
  0xb6   : > { %v297_v20 = vrot.slane %v296_v17, 2 }
  0xb7   : > { %v1787_v21 = vld [vmem:[#allocation2 + $0x10] sm:$0xff]  ;;  %v303_v22 = vrot.slane %v302_v18, 2 }
  0xb8   : > { %372 = vrot.lane.b32.xlu1 %v1787_v21, %s1613_s15  ;;  %331 = vrot.lane.b32.xlu2 %v1787_v21, %s1612_s19  ;;  %v298_v24 = vadd.f32 %v297_v20, %v296_v17 }
  0xb9   : > { %411 = vrot.lane.b32.xlu0 %v1771_v10, %s1614_s16  ;;  %v304_v25 = vadd.f32 %v303_v22, %v302_v18 }
  0xba   : > { %v299_v27 = vrot.slane %v298_v24, 1 }
  0xbb   : > { %v305_v28 = vrot.slane %v304_v25, 1 }
  0xbc   : > { %v300_v29 = vadd.f32 %v299_v27, %v298_v24 }
  0xbd   : > { %v306_v30 = vadd.f32 %v305_v28, %v304_v25  ;;  %v1888_v25 = vadd.s32 1, %v1782_v16 }
  0xbe   : > { %v307_v34 = vsel %vm255_vm4, %v300_v29, 0.0 }
  0xbf   : > { %v308_v31 = vsel %vm256_vm3, %v306_v30, 0.0  ;;  %vm280_vm11 = vcmp.lt.s32.totalorder %v1888_v25, 16 }
  0xc0   : > { %413 = vrot.lane.b32.xlu1 %v1787_v21, %s1614_s16  ;;  %368 = vrot.lane.b32.xlu2 %v1768_v9, %s1613_s15  ;;  %v311_v33 = vrot.slane %v308_v31, 7  ;;  %s1632_s15 = smov 64  }
  0xc1   : > { %452 = vrot.lane.b32.xlu0 %v1771_v10, %s1615_s13 }
  0xc2   : > { %v313_v35 = vsel %vm312_vm5, %v307_v34, %v311_v33 }
  0xc3   : > { %319 = vst.msk [vmem:[%s1811_s25] ss:$8 sm:$0x3] %vm1813_vm6, %v313_v35 }
  0xc8   : > { %454 = vrot.lane.b32.xlu1 %v1787_v21, %s1615_s13  ;;  %409 = vrot.lane.b32.xlu2 %v1768_v9, %s1614_s16  ;;  %s1633_s16 = smov 61  }
  0xc9   : > { %493 = vrot.lane.b32.xlu0 %v1771_v10, %s1616_s26 }
  0xd0   : > { %495 = vrot.lane.b32.xlu1 %v1787_v21, %s1616_s26  ;;  %450 = vrot.lane.b32.xlu2 %v1768_v9, %s1615_s13 }
  0xd1   : > { %534 = vrot.lane.b32.xlu0 %v1771_v10, %s1617_s3 }
  0xd8   : > { %536 = vrot.lane.b32.xlu1 %v1787_v21, %s1617_s3  ;;  %491 = vrot.lane.b32.xlu2 %v1768_v9, %s1616_s26 }
  0xd9   : > { %575 = vrot.lane.b32.xlu0 %v1771_v10, %s1618_s4 }
  0xe0   : > { %577 = vrot.lane.b32.xlu1 %v1787_v21, %s1618_s4  ;;  %532 = vrot.lane.b32.xlu2 %v1768_v9, %s1617_s3 }
  0xe1   : > { %616 = vrot.lane.b32.xlu0 %v1771_v10, %s1619_s5 }
  0xe8   : > { %618 = vrot.lane.b32.xlu1 %v1787_v21, %s1619_s5  ;;  %573 = vrot.lane.b32.xlu2 %v1768_v9, %s1618_s4 }
  0xe9   : > { %657 = vrot.lane.b32.xlu0 %v1771_v10, %s1620_s12 }
  0xf0   : > { %659 = vrot.lane.b32.xlu1 %v1787_v21, %s1620_s12  ;;  %614 = vrot.lane.b32.xlu2 %v1768_v9, %s1619_s5 }
  0xf1   : > { %698 = vrot.lane.b32.xlu0 %v1771_v10, %s1621_s27 }
  0xf8   : > { %700 = vrot.lane.b32.xlu1 %v1787_v21, %s1621_s27  ;;  %655 = vrot.lane.b32.xlu2 %v1768_v9, %s1620_s12 }
  0xf9   : > { %739 = vrot.lane.b32.xlu0 %v1771_v10, %s1622_s28 }
 0x100   : > { %741 = vrot.lane.b32.xlu1 %v1787_v21, %s1622_s28  ;;  %696 = vrot.lane.b32.xlu2 %v1768_v9, %s1621_s27 }
 0x101   : > { %780 = vrot.lane.b32.xlu0 %v1771_v10, %s1623_s30 }
 0x108   : > { %782 = vrot.lane.b32.xlu1 %v1787_v21, %s1623_s30  ;;  %737 = vrot.lane.b32.xlu2 %v1768_v9, %s1622_s28 }
 0x109   : > { %821 = vrot.lane.b32.xlu0 %v1771_v10, %s1624_s22 }
 0x110   : > { %823 = vrot.lane.b32.xlu1 %v1787_v21, %s1624_s22  ;;  %778 = vrot.lane.b32.xlu2 %v1768_v9, %s1623_s30 }
 0x111   : > { %862 = vrot.lane.b32.xlu0 %v1771_v10, %s1625_s20 }
 0x112   : > { %v1854_v36 = vpop.permute.xlu2 %331 }
 0x118   : > { %864 = vrot.lane.b32.xlu1 %v1787_v21, %s1625_s20  ;;  %819 = vrot.lane.b32.xlu2 %v1768_v9, %s1624_s22 }
 0x119   : > { %903 = vrot.lane.b32.xlu0 %v1771_v10, %s1626_s21 }
 0x11a   : > { %v369_v37 = vpop.permute.xlu2 %368 }
 0x120   : > { %905 = vrot.lane.b32.xlu1 %v1787_v21, %s1626_s21  ;;  %860 = vrot.lane.b32.xlu2 %v1768_v9, %s1625_s20 }
 0x121   : > { %944 = vrot.lane.b32.xlu0 %v1771_v10, %s1627_s6 }
 0x122   : > { %v1862_v38 = vpop.permute.xlu1 %327  ;;  %v410_v39 = vpop.permute.xlu2 %409 }
 0x123   : > { %v371_v40 = vpop.permute.xlu0 %370 }
 0x124   : > { %v375_v41 = vsel %vm374_vm7, %v369_v37, %v371_v40  ;;  %v1898_v37 = vadd.s32 1, %v1785_v19 }
 0x125   : > { %v379_v42 = vmul.f32 %v375_v41, %v1763_v6 }
 0x126   : > { %vm279_vm12 = vcmp.lt.s32.totalorder %v1898_v37, 16 }
 0x127   : > { %v381_v43 = vrot.slane %v379_v42, 4 }
 0x128   : > { %946 = vrot.lane.b32.xlu1 %v1787_v21, %s1627_s6  ;;  %901 = vrot.lane.b32.xlu2 %v1768_v9, %s1626_s21 }
 0x129   : > { %985 = vrot.lane.b32.xlu0 %v1771_v10, %s1628_s8  ;;  %v382_v46 = vadd.f32 %v381_v43, %v379_v42 }
 0x12a   : > { %v373_v44 = vpop.permute.xlu1 %372  ;;  %v451_v45 = vpop.permute.xlu2 %450 }
 0x12b   : > { %v376_v47 = vsel %vm374_vm7, %v371_v40, %v373_v44  ;;  %v412_v48 = vpop.permute.xlu0 %411  ;;  %v383_v52 = vrot.slane %v382_v46, 2 }
 0x12c   : > { %v380_v49 = vmul.f32 %v376_v47, %v1766_v7  ;;  %v416_v50 = vsel %vm415_vm8, %v410_v39, %v412_v48 }
 0x12d   : > { %v420_v51 = vmul.f32 %v416_v50, %v1763_v6  ;;  %v384_v57 = vadd.f32 %v383_v52, %v382_v46  ;;  %v1915_v50 = vadd.s32 2, %v1782_v16 }
 0x12e   : > { %v387_v53 = vrot.slane %v380_v49, 4 }
 0x12f   : > { %v422_v54 = vrot.slane %v420_v51, 4  ;;  %v385_v4 = vrot.slane %v384_v57, 1  ;;  %vm288_vm14 = vcmp.lt.s32.totalorder %v1915_v50, 16 }
 0x130   : > { %v388_v55 = vadd.f32 %v387_v53, %v380_v49  ;;  %942 = vrot.lane.b32.xlu2 %v1768_v9, %s1627_s6  ;;  %329 = vrot.lane.b32.xlu1 %v1771_v10, %s1612_s19  ;;  %s1631_s19 = smov 63   ;;  %v1912_v49 = vadd.s32 2, %v1785_v19 }
 0x131   : > { %v423_v56 = vadd.f32 %v422_v54, %v420_v51  ;;  %1026 = vrot.lane.b32.xlu0 %v1771_v10, %s1629_s9  ;;  %v386_v17 = vadd.f32 %v385_v4, %v384_v57 }
 0x132   : > { %v389_v58 = vrot.slane %v388_v55, 2  ;;  %v414_v59 = vpop.permute.xlu1 %413  ;;  %v492_v60 = vpop.permute.xlu2 %491  ;;  %vm287_vm15 = vcmp.lt.s32.totalorder %v1912_v49, 16 }
 0x133   : > { %v417_v61 = vsel %vm415_vm8, %v412_v48, %v414_v59  ;;  %v424_v62 = vrot.slane %v423_v56, 2  ;;  %v453_v63 = vpop.permute.xlu0 %452  ;;  %vm661_vm8 = vcmask 883712  }
 0x134   : > { %v390_v0 = vadd.f32 %v389_v58, %v388_v55  ;;  %v421_v1 = vmul.f32 %v417_v61, %v1766_v7  ;;  %v457_v2 = vsel %vm456_vm9, %v451_v45, %v453_v63 }
 0x135   : > { %v461_v3 = vmul.f32 %v457_v2, %v1763_v6  ;;  %v425_v11 = vadd.f32 %v424_v62, %v423_v56 }
 0x136   : > { %v391_v5 = vrot.slane %v390_v0, 1  ;;  %v428_v8 = vrot.slane %v421_v1, 4 }
 0x137   : > { %v463_v12 = vrot.slane %v461_v3, 4  ;;  %v426_v27 = vrot.slane %v425_v11, 1 }
 0x138   : > { %v392_v13 = vadd.f32 %v391_v5, %v390_v0  ;;  %v429_v14 = vadd.f32 %v428_v8, %v421_v1  ;;  %983 = vrot.lane.b32.xlu2 %v1768_v9, %s1628_s8  ;;  %987 = vrot.lane.b32.xlu1 %v1787_v21, %s1628_s8 }
 0x139   : > { %v464_v15 = vadd.f32 %v463_v12, %v461_v3  ;;  %1069 = vrot.lane.b32.xlu0 %v1787_v21, %s1630_s29  ;;  %v427_v44 = vadd.f32 %v426_v27, %v425_v11 }
 0x13a   : > { %v397_v18 = vrot.slane %v392_v13, 7  ;;  %v430_v20 = vrot.slane %v429_v14, 2  ;;  %v455_v22 = vpop.permute.xlu1 %454  ;;  %v533_v24 = vpop.permute.xlu2 %532 }
 0x13b   : > { %v458_v28 = vsel %vm456_vm9, %v453_v63, %v455_v22  ;;  %v465_v29 = vrot.slane %v464_v15, 2  ;;  %v494_v30 = vpop.permute.xlu0 %493  ;;  %v434_v59 = vsel %vm279_vm12, %v427_v44, 0.0  ;;  %vm702_vm9 = vcmask 785408  }
 0x13c   : > { %v398_v31 = vsel %vm312_vm5, %v386_v17, %v397_v18  ;;  %v431_v33 = vadd.f32 %v430_v20, %v429_v14  ;;  %v462_v34 = vmul.f32 %v458_v28, %v1766_v7  ;;  %v498_v35 = vsel %vm497_vm10, %v492_v60, %v494_v30 }
 0x13d   : > { %1410 = vst.msk [vmem:[%s1811_s25 + $0x2] ss:$8 sm:$0x3] %vm1813_vm6, %v398_v31  ;;  %v502_v39 = vmul.f32 %v498_v35, %v1763_v6  ;;  %v466_v42 = vadd.f32 %v465_v29, %v464_v15 }
 0x13e   : > { %v432_v40 = vrot.slane %v431_v33, 1  ;;  %v469_v41 = vrot.slane %v462_v34, 4 }
 0x13f   : > { %v504_v43 = vrot.slane %v502_v39, 4  ;;  %v467_v55 = vrot.slane %v466_v42, 1 }
 0x140   : > { %v433_v45 = vadd.f32 %v432_v40, %v431_v33  ;;  %v470_v46 = vadd.f32 %v469_v41, %v462_v34  ;;  %1024 = vrot.lane.b32.xlu2 %v1768_v9, %s1629_s9  ;;  %1028 = vrot.lane.b32.xlu1 %v1787_v21, %s1629_s9 }
 0x141   : > { %v505_v47 = vadd.f32 %v504_v43, %v502_v39  ;;  %1149 = vrot.lane.b32.xlu0 %v1771_v10, %s1631_s19  ;;  %v468_v3 = vadd.f32 %v467_v55, %v466_v42 }
 0x142   : > { %v435_v48 = vsel %vm280_vm11, %v433_v45, 0.0  ;;  %v471_v51 = vrot.slane %v470_v46, 2  ;;  %v496_v52 = vpop.permute.xlu1 %495  ;;  %v574_v53 = vpop.permute.xlu2 %573 }
 0x143   : > { %v438_v54 = vrot.slane %v435_v48, 7  ;;  %v499_v56 = vsel %vm497_vm10, %v494_v30, %v496_v52  ;;  %v506_v57 = vrot.slane %v505_v47, 2  ;;  %v535_v58 = vpop.permute.xlu0 %534  ;;  %v475_v18 = vsel %vm287_vm15, %v468_v3, 0.0 }
 0x144   : > { %v472_v60 = vadd.f32 %v471_v51, %v470_v46  ;;  %v503_v61 = vmul.f32 %v499_v56, %v1766_v7  ;;  %v539_v62 = vsel %vm538_vm13, %v533_v24, %v535_v58  ;;  %vm743_vm10 = vcmask 777216  }
 0x145   : > { %v439_v63 = vsel %vm312_vm5, %v434_v59, %v438_v54  ;;  %v543_v0 = vmul.f32 %v539_v62, %v1763_v6  ;;  %v507_v4 = vadd.f32 %v506_v57, %v505_v47  ;;  %v1958_v54 = vadd.s32 4294967295, %v1782_v16 }
 0x146   : > { %1411 = vst.msk [vmem:[%s1811_s25 + $0x3] ss:$8 sm:$0x3] %vm1813_vm6, %v439_v63  ;;  %v473_v1 = vrot.slane %v472_v60, 1  ;;  %v510_v2 = vrot.slane %v503_v61, 4  ;;  %v1965_v62 = vadd.s32 4294967295, %v1785_v19 }
 0x147   : > { %v545_v5 = vrot.slane %v543_v0, 4  ;;  %v508_v22 = vrot.slane %v507_v4, 1  ;;  %vm264_vm2 = vcmp.ge.s32.totalorder %v1958_v54, 0 }
 0x148   : > { %v474_v8 = vadd.f32 %v473_v1, %v472_v60  ;;  %v511_v11 = vadd.f32 %v510_v2, %v503_v61  ;;  %1067 = vrot.lane.b32.xlu2 %v1771_v10, %s1630_s29  ;;  %1108 = vrot.lane.b32.xlu1 %v1771_v10, %s1632_s15  ;;  %vm263_vm7 = vcmp.ge.s32.totalorder %v1965_v62, 0 }
 0x149   : > { %v546_v12 = vadd.f32 %v545_v5, %v543_v0  ;;  %1233 = vrot.lane.b32.xlu0 %v1787_v21, %s1633_s16  ;;  %v509_v40 = vadd.f32 %v508_v22, %v507_v4 }
 0x14a   : > { %v476_v13 = vsel %vm288_vm14, %v474_v8, 0.0  ;;  %v512_v14 = vrot.slane %v511_v11, 2  ;;  %v537_v15 = vpop.permute.xlu1 %536  ;;  %v615_v17 = vpop.permute.xlu2 %614 }
 0x14b   : > { %v479_v20 = vrot.slane %v476_v13, 7  ;;  %v540_v24 = vsel %vm538_vm13, %v535_v58, %v537_v15  ;;  %v576_v27 = vpop.permute.xlu0 %575  ;;  %v547_v30 = vrot.slane %v546_v12, 2  ;;  %v516_v52 = vsel %vm255_vm4, %v509_v40, 0.0 }
 0x14c   : > { %v513_v28 = vadd.f32 %v512_v14, %v511_v11  ;;  %v544_v29 = vmul.f32 %v540_v24, %v1766_v7  ;;  %v580_v31 = vsel %vm579_vm0, %v574_v53, %v576_v27  ;;  %vm784_vm13 = vcmask 769024  }
 0x14d   : > { %v480_v33 = vsel %vm312_vm5, %v475_v18, %v479_v20  ;;  %v584_v34 = vmul.f32 %v580_v31, %v1763_v6  ;;  %v548_v43 = vadd.f32 %v547_v30, %v546_v12 }
 0x14e   : > { %1412 = vst.msk [vmem:[%s1811_s25 + $0x4] ss:$8 sm:$0x3] %vm1813_vm6, %v480_v33  ;;  %v514_v35 = vrot.slane %v513_v28, 1  ;;  %v551_v39 = vrot.slane %v544_v29, 4 }
 0x14f   : > { %v586_v41 = vrot.slane %v584_v34, 4  ;;  %v549_v57 = vrot.slane %v548_v43, 1 }
 0x150   : > { %v515_v42 = vadd.f32 %v514_v35, %v513_v28  ;;  %v552_v44 = vadd.f32 %v551_v39, %v544_v29  ;;  %1110 = vrot.lane.b32.xlu2 %v1787_v21, %s1632_s15  ;;  %1151 = vrot.lane.b32.xlu1 %v1787_v21, %s1631_s19 }
 0x151   : > { %1190 = vrot.lane.b32.xlu0 %v1771_v10, %s1634_s18  ;;  %v587_v51 = vadd.f32 %v586_v41, %v584_v34  ;;  %v550_v3 = vadd.f32 %v549_v57, %v548_v43 }
 0x152   : > { %v517_v45 = vsel %vm256_vm3, %v515_v42, 0.0  ;;  %v553_v46 = vrot.slane %v552_v44, 2  ;;  %v578_v47 = vpop.permute.xlu1 %577  ;;  %v656_v48 = vpop.permute.xlu2 %655 }
 0x153   : > { %v520_v53 = vrot.slane %v517_v45, 7  ;;  %v581_v55 = vsel %vm579_vm0, %v576_v27, %v578_v47  ;;  %v617_v56 = vpop.permute.xlu0 %616  ;;  %v588_v0 = vrot.slane %v587_v51, 2  ;;  %v557_v20 = vsel %vm263_vm7, %v550_v3, 0.0 }
 0x154   : > { %v554_v58 = vadd.f32 %v553_v46, %v552_v44  ;;  %v585_v59 = vmul.f32 %v581_v55, %v1766_v7  ;;  %v621_v60 = vsel %vm620_vm1, %v615_v17, %v617_v56  ;;  %vm825_vm0 = vcmask 760832  }
 0x155   : > { %v521_v61 = vsel %vm312_vm5, %v516_v52, %v520_v53  ;;  %v625_v63 = vmul.f32 %v621_v60, %v1763_v6  ;;  %v589_v11 = vadd.f32 %v588_v0, %v587_v51 }
 0x156   : > { %1413 = vst.msk [vmem:[%s1811_s25 + $0x5] ss:$8 sm:$0x3] %vm1813_vm6, %v521_v61  ;;  %v555_v16 = vrot.slane %v554_v58, 1  ;;  %v592_v1 = vrot.slane %v585_v59, 4 }
 0x157   : > { %v627_v2 = vrot.slane %v625_v63, 4  ;;  %v590_v30 = vrot.slane %v589_v11, 1 }
 0x158   : > { %v556_v4 = vadd.f32 %v555_v16, %v554_v58  ;;  %v593_v5 = vadd.f32 %v592_v1, %v585_v59  ;;  %1231 = vrot.lane.b32.xlu2 %v1771_v10, %s1633_s16  ;;  %1272 = vrot.lane.b32.xlu1 %v1771_v10, %s1635_s23 }
 0x159   : > { %v628_v19 = vadd.f32 %v627_v2, %v625_v63  ;;  %1106 = vrot.lane.b32.xlu0 %v1768_v9, %s1632_s15  ;;  %v591_v42 = vadd.f32 %v590_v30, %v589_v11 }
 0x15a   : > { %v558_v8 = vsel %vm264_vm2, %v556_v4, 0.0  ;;  %v594_v12 = vrot.slane %v593_v5, 2  ;;  %v619_v13 = vpop.permute.xlu1 %618  ;;  %v697_v14 = vpop.permute.xlu2 %696 }
 0x15b   : > { %v561_v15 = vrot.slane %v558_v8, 7  ;;  %v622_v17 = vsel %vm620_vm1, %v617_v56, %v619_v13  ;;  %v629_v18 = vrot.slane %v628_v19, 2  ;;  %v658_v10 = vpop.permute.xlu0 %657  ;;  %vm866_vm1 = vcmask 752640  }
 0x15c   : > { %v595_v22 = vadd.f32 %v594_v12, %v593_v5  ;;  %v626_v24 = vmul.f32 %v622_v17, %v1766_v7  ;;  %v662_v27 = vsel %vm661_vm8, %v656_v48, %v658_v10 }
 0x15d   : > { %v562_v28 = vsel %vm312_vm5, %v557_v20, %v561_v15  ;;  %v666_v29 = vmul.f32 %v662_v27, %v1763_v6  ;;  %v630_v34 = vadd.f32 %v629_v18, %v628_v19 }
 0x15e   : > { %1414 = vst.msk [vmem:[%s1811_s25 + $0x6] ss:$8 sm:$0x3] %vm1813_vm6, %v562_v28  ;;  %v596_v31 = vrot.slane %v595_v22, 1  ;;  %v633_v33 = vrot.slane %v626_v24, 4 }
 0x15f   : > { %v668_v35 = vrot.slane %v666_v29, 4  ;;  %v631_v47 = vrot.slane %v630_v34, 1 }
 0x160   : > { %v597_v39 = vadd.f32 %v596_v31, %v595_v22  ;;  %v634_v40 = vadd.f32 %v633_v33, %v626_v24  ;;  %1274 = vrot.lane.b32.xlu2 %v1787_v21, %s1635_s23  ;;  %1192 = vrot.lane.b32.xlu1 %v1787_v21, %s1634_s18 }
 0x161   : > { %v669_v41 = vadd.f32 %v668_v35, %v666_v29  ;;  %1270 = vrot.lane.b32.xlu0 %v1768_v9, %s1635_s23  ;;  %v632_v63 = vadd.f32 %v631_v47, %v630_v34 }
 0x162   : > { %v602_v43 = vrot.slane %v597_v39, 7  ;;  %v635_v44 = vrot.slane %v634_v40, 2  ;;  %v660_v45 = vpop.permute.xlu1 %659  ;;  %v738_v46 = vpop.permute.xlu2 %737 }
 0x163   : > { %v663_v48 = vsel %vm661_vm8, %v658_v10, %v660_v45  ;;  %v670_v51 = vrot.slane %v669_v41, 2  ;;  %v699_v52 = vpop.permute.xlu0 %698  ;;  %vm907_vm8 = vcmask 654336  }
 0x164   : > { %v603_v53 = vsel %vm312_vm5, %v591_v42, %v602_v43  ;;  %v636_v55 = vadd.f32 %v635_v44, %v634_v40  ;;  %v667_v21 = vmul.f32 %v663_v48, %v1766_v7  ;;  %v703_v56 = vsel %vm702_vm9, %v697_v14, %v699_v52 }
 0x165   : > { %1415 = vst.msk [vmem:[%s1811_s25 + $0x7] ss:$8 sm:$0x3] %vm1813_vm6, %v603_v53  ;;  %v707_v57 = vmul.f32 %v703_v56, %v1763_v6  ;;  %v671_v60 = vadd.f32 %v670_v51, %v669_v41  ;;  %v639_v14 = vsel %vm279_vm12, %v632_v63, 0.0 }
 0x166   : > { %v637_v58 = vrot.slane %v636_v55, 1  ;;  %v674_v59 = vrot.slane %v667_v21, 4 }
 0x167   : > { %v709_v61 = vrot.slane %v707_v57, 4  ;;  %v672_v8 = vrot.slane %v671_v60, 1 }
 0x168   : > { %v638_v16 = vadd.f32 %v637_v58, %v636_v55  ;;  %v675_v0 = vadd.f32 %v674_v59, %v667_v21  ;;  %1065 = vrot.lane.b32.xlu2 %v1768_v9, %s1630_s29  ;;  %1147 = vrot.lane.b32.xlu1 %v1768_v9, %s1631_s19 }
 0x169   : > { %v710_v1 = vadd.f32 %v709_v61, %v707_v57  ;;  %v673_v27 = vadd.f32 %v672_v8, %v671_v60 }
 0x16a   : > { %v640_v2 = vsel %vm280_vm11, %v638_v16, 0.0  ;;  %v676_v3 = vrot.slane %v675_v0, 2  ;;  %v701_v4 = vpop.permute.xlu1 %700  ;;  %v779_v5 = vpop.permute.xlu2 %778 }
 0x16b   : > { %v643_v19 = vrot.slane %v640_v2, 7  ;;  %v704_v11 = vsel %vm702_vm9, %v699_v52, %v701_v4  ;;  %v711_v12 = vrot.slane %v710_v1, 2  ;;  %v740_v13 = vpop.permute.xlu0 %739  ;;  %v680_v41 = vsel %vm287_vm15, %v673_v27, 0.0 }
 0x16c   : > { %v677_v15 = vadd.f32 %v676_v3, %v675_v0  ;;  %v708_v17 = vmul.f32 %v704_v11, %v1766_v7  ;;  %v744_v18 = vsel %vm743_vm10, %v738_v46, %v740_v13  ;;  %vm948_vm9 = vcmask 646144  }
 0x16d   : > { %v644_v10 = vsel %vm312_vm5, %v639_v14, %v643_v19  ;;  %v748_v20 = vmul.f32 %v744_v18, %v1763_v6  ;;  %v712_v28 = vadd.f32 %v711_v12, %v710_v1 }
 0x16e   : > { %1416 = vst.msk [vmem:[%s1811_s25 + $0x10] ss:$8 sm:$0x3] %vm1813_vm6, %v644_v10  ;;  %v678_v22 = vrot.slane %v677_v15, 1  ;;  %v715_v24 = vrot.slane %v708_v17, 4 }
 0x16f   : > { %v750_v29 = vrot.slane %v748_v20, 4  ;;  %v713_v43 = vrot.slane %v712_v28, 1 }
 0x170   : > { %v679_v30 = vadd.f32 %v678_v22, %v677_v15  ;;  %v716_v31 = vadd.f32 %v715_v24, %v708_v17  ;;  %1229 = vrot.lane.b32.xlu2 %v1768_v9, %s1633_s16  ;;  %1188 = vrot.lane.b32.xlu1 %v1768_v9, %s1634_s18 }
 0x171   : > { %v751_v33 = vadd.f32 %v750_v29, %v748_v20  ;;  %v714_v21 = vadd.f32 %v713_v43, %v712_v28 }
 0x172   : > { %v681_v34 = vsel %vm288_vm14, %v679_v30, 0.0  ;;  %v717_v35 = vrot.slane %v716_v31, 2  ;;  %v742_v39 = vpop.permute.xlu1 %741  ;;  %v820_v40 = vpop.permute.xlu2 %819 }
 0x173   : > { %v684_v42 = vrot.slane %v681_v34, 7  ;;  %v745_v44 = vsel %vm743_vm10, %v740_v13, %v742_v39  ;;  %v781_v45 = vpop.permute.xlu0 %780  ;;  %v752_v47 = vrot.slane %v751_v33, 2  ;;  %v721_v1 = vsel %vm255_vm4, %v714_v21, 0.0 }
 0x174   : > { %v718_v46 = vadd.f32 %v717_v35, %v716_v31  ;;  %v749_v9 = vmul.f32 %v745_v44, %v1766_v7  ;;  %v785_v48 = vsel %vm784_vm13, %v779_v5, %v781_v45  ;;  %vm989_vm10 = vcmask 637952  }
 0x175   : > { %v685_v51 = vsel %vm312_vm5, %v680_v41, %v684_v42  ;;  %v789_v52 = vmul.f32 %v785_v48, %v1763_v6  ;;  %v753_v58 = vadd.f32 %v752_v47, %v751_v33 }
 0x176   : > { %1417 = vst.msk [vmem:[%s1811_s25 + $0x11] ss:$8 sm:$0x3] %vm1813_vm6, %v685_v51  ;;  %v719_v53 = vrot.slane %v718_v46, 1  ;;  %v756_v55 = vrot.slane %v749_v9, 4 }
 0x177   : > { %v791_v56 = vrot.slane %v789_v52, 4  ;;  %v754_v5 = vrot.slane %v753_v58, 1 }
 0x178   : > { %v720_v57 = vadd.f32 %v719_v53, %v718_v46  ;;  %v757_v59 = vadd.f32 %v756_v55, %v749_v9 }
 0x179   : > { %v792_v0 = vadd.f32 %v791_v56, %v789_v52  ;;  %v755_v10 = vadd.f32 %v754_v5, %v753_v58 }
 0x17a   : > { %v722_v60 = vsel %vm256_vm3, %v720_v57, 0.0  ;;  %v758_v61 = vrot.slane %v757_v59, 2  ;;  %v783_v63 = vpop.permute.xlu1 %782  ;;  %v861_v16 = vpop.permute.xlu2 %860 }
 0x17b   : > { %v725_v2 = vrot.slane %v722_v60, 7  ;;  %v786_v3 = vsel %vm784_vm13, %v781_v45, %v783_v63  ;;  %v822_v4 = vpop.permute.xlu0 %821  ;;  %v793_v15 = vrot.slane %v792_v0, 2  ;;  %vm333_vm13 = vcmask 1039360  }
 0x17c   : > { %v759_v19 = vadd.f32 %v758_v61, %v757_v59  ;;  %v790_v8 = vmul.f32 %v786_v3, %v1766_v7  ;;  %v826_v11 = vsel %vm825_vm0, %v820_v40, %v822_v4  ;;  %v762_v40 = vsel %vm263_vm7, %v755_v10, 0.0 }
 0x17d   : > { %v726_v12 = vsel %vm312_vm5, %v721_v1, %v725_v2  ;;  %v830_v13 = vmul.f32 %v826_v11, %v1763_v6  ;;  %v794_v28 = vadd.f32 %v793_v15, %v792_v0 }
 0x17e   : > { %1418 = vst.msk [vmem:[%s1811_s25 + $0x12] ss:$8 sm:$0x3] %vm1813_vm6, %v726_v12  ;;  %v760_v14 = vrot.slane %v759_v19, 1  ;;  %v797_v17 = vrot.slane %v790_v8, 4 }
 0x17f   : > { %v832_v18 = vrot.slane %v830_v13, 4  ;;  %v795_v46 = vrot.slane %v794_v28, 1 }
 0x180   : > { %v761_v20 = vadd.f32 %v760_v14, %v759_v19  ;;  %v798_v22 = vadd.f32 %v797_v17, %v790_v8 }
 0x181   : > { %v833_v24 = vadd.f32 %v832_v18, %v830_v13  ;;  %v796_v21 = vadd.f32 %v795_v46, %v794_v28 }
 0x182   : > { %v763_v27 = vsel %vm264_vm2, %v761_v20, 0.0  ;;  %v799_v29 = vrot.slane %v798_v22, 2  ;;  %v824_v30 = vpop.permute.xlu1 %823  ;;  %v902_v31 = vpop.permute.xlu2 %901 }
 0x183   : > { %v766_v33 = vrot.slane %v763_v27, 7  ;;  %v827_v34 = vsel %vm825_vm0, %v822_v4, %v824_v30  ;;  %v834_v35 = vrot.slane %v833_v24, 2  ;;  %v863_v39 = vpop.permute.xlu0 %862  ;;  %vm1030_vm0 = vcmask 629760  }
 0x184   : > { %v800_v41 = vadd.f32 %v799_v29, %v798_v22  ;;  %v831_v42 = vmul.f32 %v827_v34, %v1766_v7  ;;  %v867_v43 = vsel %vm866_vm1, %v861_v16, %v863_v39 }
 0x185   : > { %v767_v44 = vsel %vm312_vm5, %v762_v40, %v766_v33  ;;  %v871_v45 = vmul.f32 %v867_v43, %v1763_v6  ;;  %v835_v48 = vadd.f32 %v834_v35, %v833_v24 }
 0x186   : > { %1419 = vst.msk [vmem:[%s1811_s25 + $0x13] ss:$8 sm:$0x3] %vm1813_vm6, %v767_v44  ;;  %v801_v9 = vrot.slane %v800_v41, 1  ;;  %v838_v47 = vrot.slane %v831_v42, 4 }
 0x187   : > { %v873_v51 = vrot.slane %v871_v45, 4  ;;  %v836_v60 = vrot.slane %v835_v48, 1 }
 0x188   : > { %v802_v52 = vadd.f32 %v801_v9, %v800_v41  ;;  %v839_v53 = vadd.f32 %v838_v47, %v831_v42 }
 0x189   : > { %v874_v55 = vadd.f32 %v873_v51, %v871_v45  ;;  %v837_v8 = vadd.f32 %v836_v60, %v835_v48 }
 0x18a   : > { %v807_v56 = vrot.slane %v802_v52, 7  ;;  %v840_v57 = vrot.slane %v839_v53, 2  ;;  %v865_v58 = vpop.permute.xlu1 %864  ;;  %v943_v59 = vpop.permute.xlu2 %942 }
 0x18b   : > { %v868_v61 = vsel %vm866_vm1, %v863_v39, %v865_v58  ;;  %v875_v63 = vrot.slane %v874_v55, 2  ;;  %v904_v16 = vpop.permute.xlu0 %903  ;;  %v844_v22 = vsel %vm279_vm12, %v837_v8, 0.0  ;;  %vm1071_vm1 = vcmask 621568  }
 0x18c   : > { %v808_v0 = vsel %vm312_vm5, %v796_v21, %v807_v56  ;;  %v841_v1 = vadd.f32 %v840_v57, %v839_v53  ;;  %v872_v2 = vmul.f32 %v868_v61, %v1766_v7  ;;  %v908_v3 = vsel %vm907_vm8, %v902_v31, %v904_v16 }
 0x18d   : > { %1420 = vst.msk [vmem:[%s1811_s25 + $0x14] ss:$8 sm:$0x3] %vm1813_vm6, %v808_v0  ;;  %v912_v4 = vmul.f32 %v908_v3, %v1763_v6  ;;  %v876_v11 = vadd.f32 %v875_v63, %v874_v55 }
 0x18e   : > { %v842_v5 = vrot.slane %v841_v1, 1  ;;  %v879_v19 = vrot.slane %v872_v2, 4 }
 0x18f   : > { %v914_v12 = vrot.slane %v912_v4, 4  ;;  %v877_v27 = vrot.slane %v876_v11, 1 }
 0x190   : > { %v843_v13 = vadd.f32 %v842_v5, %v841_v1  ;;  %v880_v14 = vadd.f32 %v879_v19, %v872_v2 }
 0x191   : > { %v915_v15 = vadd.f32 %v914_v12, %v912_v4  ;;  %v878_v43 = vadd.f32 %v877_v27, %v876_v11 }
 0x192   : > { %v845_v17 = vsel %vm280_vm11, %v843_v13, 0.0  ;;  %v881_v18 = vrot.slane %v880_v14, 2  ;;  %v906_v10 = vpop.permute.xlu1 %905  ;;  %v984_v20 = vpop.permute.xlu2 %983 }
 0x193   : > { %v848_v24 = vrot.slane %v845_v17, 7  ;;  %v909_v28 = vsel %vm907_vm8, %v904_v16, %v906_v10  ;;  %v945_v29 = vpop.permute.xlu0 %944  ;;  %v916_v33 = vrot.slane %v915_v15, 2  ;;  %v885_v57 = vsel %vm287_vm15, %v878_v43, 0.0  ;;  %v2102_v10 = vld [vmem:[%s1751_s7] sm:$0xff] }
 0x194   : > { %v882_v30 = vadd.f32 %v881_v18, %v880_v14  ;;  %v913_v31 = vmul.f32 %v909_v28, %v1766_v7  ;;  %v949_v34 = vsel %vm948_vm9, %v943_v59, %v945_v29  ;;  %vm1112_vm8 = vcmask 523264  }
 0x195   : > { %v849_v35 = vsel %vm312_vm5, %v844_v22, %v848_v24  ;;  %v953_v39 = vmul.f32 %v949_v34, %v1763_v6  ;;  %v917_v45 = vadd.f32 %v916_v33, %v915_v15  ;;  %v2106_v22 = vld [vmem:[%s1751_s7 + $0x8] sm:$0xff] }
 0x196   : > { %1421 = vst.msk [vmem:[%s1811_s25 + $0x15] ss:$8 sm:$0x3] %vm1813_vm6, %v849_v35  ;;  %v883_v40 = vrot.slane %v882_v30, 1  ;;  %v920_v41 = vrot.slane %v913_v31, 4 }
 0x197   : > { %v955_v42 = vrot.slane %v953_v39, 4  ;;  %v918_v58 = vrot.slane %v917_v45, 1 }
 0x198   : > { %v884_v44 = vadd.f32 %v883_v40, %v882_v30  ;;  %v921_v46 = vadd.f32 %v920_v41, %v913_v31 }
 0x199   : > { %v956_v9 = vadd.f32 %v955_v42, %v953_v39  ;;  %v919_v2 = vadd.f32 %v918_v58, %v917_v45 }
 0x19a   : > { %v886_v47 = vsel %vm288_vm14, %v884_v44, 0.0  ;;  %v922_v48 = vrot.slane %v921_v46, 2  ;;  %v947_v51 = vpop.permute.xlu1 %946  ;;  %v1025_v52 = vpop.permute.xlu2 %1024 }
 0x19b   : > { %v889_v53 = vrot.slane %v886_v47, 7  ;;  %v950_v55 = vsel %vm948_vm9, %v945_v29, %v947_v51  ;;  %v957_v21 = vrot.slane %v956_v9, 2  ;;  %v986_v56 = vpop.permute.xlu0 %985  ;;  %v926_v18 = vsel %vm255_vm4, %v919_v2, 0.0 }
 0x19c   : > { %v923_v59 = vadd.f32 %v922_v48, %v921_v46  ;;  %v954_v60 = vmul.f32 %v950_v55, %v1766_v7  ;;  %v990_v0 = vsel %vm989_vm10, %v984_v20, %v986_v56  ;;  %vm1235_vm9 = vcmask 498688  }
 0x19d   : > { %v890_v61 = vsel %vm312_vm5, %v885_v57, %v889_v53  ;;  %v958_v1 = vadd.f32 %v957_v21, %v956_v9  ;;  %v994_v5 = vmul.f32 %v990_v0, %v1763_v6 }
 0x19e   : > { %1422 = vst.msk [vmem:[%s1811_s25 + $0x16] ss:$8 sm:$0x3] %vm1813_vm6, %v890_v61  ;;  %v924_v63 = vrot.slane %v923_v59, 1  ;;  %v961_v16 = vrot.slane %v954_v60, 4 }
 0x19f   : > { %v959_v13 = vrot.slane %v958_v1, 1  ;;  %v996_v28 = vrot.slane %v994_v5, 4 }
 0x1a0   : > { %v925_v3 = vadd.f32 %v924_v63, %v923_v59  ;;  %v962_v4 = vadd.f32 %v961_v16, %v954_v60 }
 0x1a1   : > { %v960_v31 = vadd.f32 %v959_v13, %v958_v1  ;;  %v997_v40 = vadd.f32 %v996_v28, %v994_v5 }
 0x1a2   : > { %v927_v7 = vsel %vm256_vm3, %v925_v3, 0.0  ;;  %v963_v19 = vrot.slane %v962_v4, 2  ;;  %v2095_v8 = vpop.permute.xlu2 %1067  ;;  %v330_v11 = vpop.permute.xlu1 %329 }
 0x1a3   : > { %v930_v12 = vrot.slane %v927_v7, 7  ;;  %v334_v14 = vsel %vm333_vm13, %v1862_v38, %v330_v11  ;;  %v335_v15 = vsel %vm333_vm13, %v330_v11, %v1854_v36  ;;  %v1027_v17 = vpop.permute.xlu0 %1026  ;;  %v967_v46 = vsel %vm263_vm7, %v960_v31, 0.0 }
 0x1a4   : > { %v964_v6 = vadd.f32 %v963_v19, %v962_v4  ;;  %v338_v20 = vmul.f32 %v2102_v10, %v334_v14  ;;  %v339_v24 = vmul.f32 %v2106_v22, %v335_v15  ;;  %v1031_v38 = vsel %vm1030_vm0, %v1025_v52, %v1027_v17 }
 0x1a5   : > { %v931_v27 = vsel %vm312_vm5, %v926_v18, %v930_v12  ;;  %v1035_v39 = vmul.f32 %v2102_v10, %v1031_v38  ;;  %v998_v57 = vrot.slane %v997_v40, 2  ;;  %vm1276_vm13 = vcmask 490496  }
 0x1a6   : > { %1423 = vst.msk [vmem:[%s1811_s25 + $0x17] ss:$8 sm:$0x3] %vm1813_vm6, %v931_v27  ;;  %v965_v36 = vrot.slane %v964_v6, 1  ;;  %v340_v29 = vrot.slane %v338_v20, 4  ;;  %v346_v30 = vrot.slane %v339_v24, 4 }
 0x1a7   : > { %v1037_v55 = vrot.slane %v1035_v39, 4  ;;  %v999_v3 = vadd.f32 %v998_v57, %v997_v40 }
 0x1a8   : > { %v966_v33 = vadd.f32 %v965_v36, %v964_v6  ;;  %v341_v34 = vadd.f32 %v340_v29, %v338_v20  ;;  %v347_v35 = vadd.f32 %v346_v30, %v339_v24 }
 0x1a9   : > { %v1038_v0 = vadd.f32 %v1037_v55, %v1035_v39  ;;  %v1000_v24 = vrot.slane %v999_v3, 1 }
 0x1aa   : > { %v968_v41 = vsel %vm264_vm2, %v966_v33, 0.0  ;;  %v342_v42 = vrot.slane %v341_v34, 2  ;;  %v348_v43 = vrot.slane %v347_v35, 2  ;;  %v1111_v44 = vpop.permute.xlu2 %1110  ;;  %v988_v45 = vpop.permute.xlu1 %987 }
 0x1ab   : > { %v971_v9 = vrot.slane %v968_v41, 7  ;;  %v991_v47 = vsel %vm989_vm10, %v986_v56, %v988_v45  ;;  %v1070_v48 = vpop.permute.xlu0 %1069  ;;  %v1039_v15 = vrot.slane %v1038_v0, 2  ;;  %v1001_v30 = vadd.f32 %v1000_v24, %v999_v3 }
 0x1ac   : > { %v343_v51 = vadd.f32 %v342_v42, %v341_v34  ;;  %v349_v52 = vadd.f32 %v348_v43, %v347_v35  ;;  %v995_v53 = vmul.f32 %v2106_v22, %v991_v47  ;;  %v1073_v61 = vsel %vm1071_vm1, %v2095_v8, %v1070_v48 }
 0x1ad   : > { %v972_v21 = vsel %vm312_vm5, %v967_v46, %v971_v9  ;;  %v1077_v1 = vmul.f32 %v2106_v22, %v1073_v61  ;;  %vm1153_vm10 = vcmask 515072  }
 0x1ae   : > { %1424 = vst.msk [vmem:[%s1811_s25 + $0x20] ss:$8 sm:$0x3] %vm1813_vm6, %v972_v21  ;;  %v344_v58 = vrot.slane %v343_v51, 1  ;;  %v350_v59 = vrot.slane %v349_v52, 1  ;;  %v1002_v60 = vrot.slane %v995_v53, 4 }
 0x1af   : > { %v1084_v20 = vrot.slane %v1077_v1, 4 }
 0x1b0   : > { %v345_v56 = vadd.f32 %v344_v58, %v343_v51  ;;  %v351_v63 = vadd.f32 %v350_v59, %v349_v52  ;;  %v1003_v16 = vadd.f32 %v1002_v60, %v995_v53 }
 0x1b1   : > { %v1085_v29 = vadd.f32 %v1084_v20, %v1077_v1 }
 0x1b2   : > { %v353_v2 = vsel %vm264_vm2, %v351_v63, 0.0  ;;  %v1004_v4 = vrot.slane %v1003_v16, 2  ;;  %v2130_v5 = vpop.permute.xlu2 %1231  ;;  %v1029_v7 = vpop.permute.xlu1 %1028  ;;  %v352_v13 = vsel %vm263_vm7, %v345_v56, 0.0 }
 0x1b3   : > { %v356_v19 = vrot.slane %v353_v2, 7  ;;  %v1032_v11 = vsel %vm1030_vm0, %v1027_v17, %v1029_v7  ;;  %v2133_v12 = vpop.permute.xlu0 %1149  ;;  %v1040_v17 = vadd.f32 %v1039_v15, %v1038_v0  ;;  %v1086_v46 = vrot.slane %v1085_v29, 2 }
 0x1b4   : > { %v1005_v14 = vadd.f32 %v1004_v4, %v1003_v16  ;;  %v1036_v18 = vmul.f32 %v2106_v22, %v1032_v11  ;;  %vm1194_vm0 = vcmask 506880  }
 0x1b5   : > { %v357_v6 = vsel %vm312_vm5, %v352_v13, %v356_v19  ;;  %v1041_v42 = vrot.slane %v1040_v17, 1  ;;  %v1087_v55 = vadd.f32 %v1086_v46, %v1085_v29 }
 0x1b6   : > { %1409 = vst.msk [vmem:[%s1811_s25 + $0x1] ss:$8 sm:$0x3] %vm1813_vm6, %v357_v6  ;;  %v1006_v27 = vrot.slane %v1005_v14, 1  ;;  %v1043_v28 = vrot.slane %v1036_v18, 4 }
 0x1b7   : > { %v1042_v52 = vadd.f32 %v1041_v42, %v1040_v17  ;;  %v1088_v2 = vrot.slane %v1087_v55, 1 }
 0x1b8   : > { %v1007_v38 = vadd.f32 %v1006_v27, %v1005_v14  ;;  %v1044_v36 = vadd.f32 %v1043_v28, %v1036_v18 }
 0x1b9   : > { %v1049_v16 = vsel %vm279_vm12, %v1042_v52, 0.0  ;;  %v1089_v11 = vadd.f32 %v1088_v2, %v1087_v55 }
 0x1ba   : > { %v1012_v31 = vrot.slane %v1007_v38, 7  ;;  %v1045_v33 = vrot.slane %v1044_v36, 2  ;;  %v1275_v34 = vpop.permute.xlu2 %1274  ;;  %v1109_v35 = vpop.permute.xlu1 %1108 }
 0x1bb   : > { %v1114_v39 = vsel %vm1112_vm8, %v1109_v35, %v1111_v44  ;;  %v1234_v40 = vpop.permute.xlu0 %1233 }
 0x1bc   : > { %v1013_v41 = vsel %vm312_vm5, %v1001_v30, %v1012_v31  ;;  %v1046_v43 = vadd.f32 %v1045_v33, %v1044_v36  ;;  %v1118_v45 = vmul.f32 %v2106_v22, %v1114_v39  ;;  %v1237_v9 = vsel %vm1235_vm9, %v2130_v5, %v1234_v40 }
 0x1bd   : > { %1425 = vst.msk [vmem:[%s1811_s25 + $0x21] ss:$8 sm:$0x3] %vm1813_vm6, %v1013_v41  ;;  %v1241_v48 = vmul.f32 %v2106_v22, %v1237_v9  ;;  %v1091_v36 = vsel %vm288_vm14, %v1089_v11, 0.0 }
 0x1be   : > { %v1047_v47 = vrot.slane %v1046_v43, 1  ;;  %v1125_v51 = vrot.slane %v1118_v45, 4  ;;  %v1094_v46 = vrot.slane %v1091_v36, 7 }
 0x1bf   : > { %v1248_v53 = vrot.slane %v1241_v48, 4 }
 0x1c0   : > { %v1048_v44 = vadd.f32 %v1047_v47, %v1046_v43  ;;  %v1126_v61 = vadd.f32 %v1125_v51, %v1118_v45 }
 0x1c1   : > { %v1249_v59 = vadd.f32 %v1248_v53, %v1241_v48 }
 0x1c2   : > { %v1050_v21 = vsel %vm280_vm11, %v1048_v44, 0.0  ;;  %v1066_v57 = vpop.permute.xlu2 %1065  ;;  %v1152_v58 = vpop.permute.xlu1 %1151 }
 0x1c3   : > { %v1053_v60 = vrot.slane %v1050_v21, 7  ;;  %v1072_v56 = vsel %vm1071_vm1, %v1066_v57, %v2095_v8  ;;  %v2155_v63 = vpop.permute.xlu0 %1190  ;;  %v1155_v4 = vsel %vm1153_vm10, %v2133_v12, %v1152_v58  ;;  %v1250_v7 = vrot.slane %v1249_v59, 2 }
 0x1c4   : > { %v1076_v0 = vmul.f32 %v2102_v10, %v1072_v56  ;;  %v1127_v8 = vrot.slane %v1126_v61, 2  ;;  %v1159_v13 = vmul.f32 %v2106_v22, %v1155_v4 }
 0x1c5   : > { %v1054_v1 = vsel %vm312_vm5, %v1049_v16, %v1053_v60  ;;  %v1251_v15 = vadd.f32 %v1250_v7, %v1249_v59 }
 0x1c6   : > { %1426 = vst.msk [vmem:[%s1811_s25 + $0x22] ss:$8 sm:$0x3] %vm1813_vm6, %v1054_v1  ;;  %v1078_v3 = vrot.slane %v1076_v0, 4  ;;  %v1128_v20 = vadd.f32 %v1127_v8, %v1126_v61  ;;  %v1166_v29 = vrot.slane %v1159_v13, 4 }
 0x1c7   : > { %v1252_v39 = vrot.slane %v1251_v15, 1 }
 0x1c8   : > { %v1079_v19 = vadd.f32 %v1078_v3, %v1076_v0  ;;  %v1167_v9 = vadd.f32 %v1166_v29, %v1159_v13 }
 0x1c9   : > { %v1253_v51 = vadd.f32 %v1252_v39, %v1251_v15 }
 0x1ca   : > { %v1080_v14 = vrot.slane %v1079_v19, 2  ;;  %v1230_v18 = vpop.permute.xlu2 %1229  ;;  %v1273_v6 = vpop.permute.xlu1 %1272  ;;  %v1168_v1 = vrot.slane %v1167_v9, 2 }
 0x1cb   : > { %v1236_v24 = vsel %vm1235_vm9, %v1230_v18, %v2130_v5  ;;  %v1278_v27 = vsel %vm1276_vm13, %v1273_v6, %v1275_v34  ;;  %v1107_v28 = vpop.permute.xlu0 %1106  ;;  %v1129_v5 = vrot.slane %v1128_v20, 1  ;;  %v1255_v2 = vsel %vm280_vm11, %v1253_v51, 0.0 }
 0x1cc   : > { %v1081_v38 = vadd.f32 %v1080_v14, %v1079_v19  ;;  %v1240_v17 = vmul.f32 %v2102_v10, %v1236_v24  ;;  %v1282_v30 = vmul.f32 %v2106_v22, %v1278_v27  ;;  %v1113_v31 = vsel %vm1112_vm8, %v1107_v28, %v1109_v35 }
 0x1cd   : > { %v1117_v41 = vmul.f32 %v2102_v10, %v1113_v31  ;;  %v1130_v53 = vadd.f32 %v1129_v5, %v1128_v20  ;;  %v1258_v14 = vrot.slane %v1255_v2, 7 }
 0x1ce   : > { %v1082_v33 = vrot.slane %v1081_v38, 1  ;;  %v1242_v40 = vrot.slane %v1240_v17, 4  ;;  %v1289_v42 = vrot.slane %v1282_v30, 4 }
 0x1cf   : > { %v1119_v45 = vrot.slane %v1117_v41, 4  ;;  %v1132_v7 = vsel %vm256_vm3, %v1130_v53, 0.0 }
 0x1d0   : > { %v1083_v34 = vadd.f32 %v1082_v33, %v1081_v38  ;;  %v1243_v43 = vadd.f32 %v1242_v40, %v1240_v17  ;;  %v1290_v47 = vadd.f32 %v1289_v42, %v1282_v30  ;;  %v1135_v18 = vrot.slane %v1132_v7, 7 }
 0x1d1   : > { %v1120_v44 = vadd.f32 %v1119_v45, %v1117_v41 }
 0x1d2   : > { %v1090_v48 = vsel %vm287_vm15, %v1083_v34, 0.0  ;;  %v1244_v35 = vrot.slane %v1243_v43, 2  ;;  %v1193_v52 = vpop.permute.xlu1 %1192  ;;  %v1291_v21 = vrot.slane %v1290_v47, 2 }
 0x1d3   : > { %v1095_v55 = vsel %vm312_vm5, %v1090_v48, %v1094_v46  ;;  %v1196_v57 = vsel %vm1194_vm0, %v2155_v63, %v1193_v52  ;;  %v1271_v58 = vpop.permute.xlu0 %1270  ;;  %v1121_v61 = vrot.slane %v1120_v44, 2 }
 0x1d4   : > { %1427 = vst.msk [vmem:[%s1811_s25 + $0x23] ss:$8 sm:$0x3] %vm1813_vm6, %v1095_v55  ;;  %v1245_v59 = vadd.f32 %v1244_v35, %v1243_v43  ;;  %v1200_v60 = vmul.f32 %v2106_v22, %v1196_v57  ;;  %v1277_v56 = vsel %vm1276_vm13, %v1271_v58, %v1273_v6  ;;  %v1292_v16 = vadd.f32 %v1291_v21, %v1290_v47 }
 0x1d5   : > { %v1281_v0 = vmul.f32 %v2102_v10, %v1277_v56  ;;  %v1122_v4 = vadd.f32 %v1121_v61, %v1120_v44  ;;  %v1169_v6 = vadd.f32 %v1168_v1, %v1167_v9 }
 0x1d6   : > { %v1246_v3 = vrot.slane %v1245_v59, 1  ;;  %v1293_v8 = vrot.slane %v1292_v16, 1  ;;  %v1207_v22 = vrot.slane %v1200_v60, 4 }
 0x1d7   : > { %v1283_v19 = vrot.slane %v1281_v0, 4  ;;  %v1123_v13 = vrot.slane %v1122_v4, 1  ;;  %v1170_v31 = vrot.slane %v1169_v6, 1 }
 0x1d8   : > { %v1247_v11 = vadd.f32 %v1246_v3, %v1245_v59  ;;  %v1294_v23 = vadd.f32 %v1293_v8, %v1292_v16  ;;  %v1208_v17 = vadd.f32 %v1207_v22, %v1200_v60 }
 0x1d9   : > { %v1284_v15 = vadd.f32 %v1283_v19, %v1281_v0  ;;  %v1124_v20 = vadd.f32 %v1123_v13, %v1122_v4  ;;  %v1171_v26 = vadd.f32 %v1170_v31, %v1169_v6 }
 0x1da   : > { %v1254_v25 = vsel %vm279_vm12, %v1247_v11, 0.0  ;;  %v1148_v24 = vpop.permute.xlu1 %1147  ;;  %v1209_v40 = vrot.slane %v1208_v17, 2 }
 0x1db   : > { %v1259_v27 = vsel %vm312_vm5, %v1254_v25, %v1258_v14  ;;  %v1154_v28 = vsel %vm1153_vm10, %v1148_v24, %v2133_v12  ;;  %v1285_v38 = vrot.slane %v1284_v15, 2  ;;  %v1131_v36 = vsel %vm255_vm4, %v1124_v20, 0.0 }
 0x1dc   : > { %1431 = vst.msk [vmem:[%s1811_s25 + $0x27] ss:$8 sm:$0x3] %vm1813_vm6, %v1259_v27  ;;  %v1158_v29 = vmul.f32 %v2102_v10, %v1154_v28  ;;  %v1136_v37 = vsel %vm312_vm5, %v1131_v36, %v1135_v18  ;;  %v1296_v12 = vsel %vm288_vm14, %v1294_v23, 0.0  ;;  %v1210_v9 = vadd.f32 %v1209_v40, %v1208_v17 }
 0x1dd   : > { %v1286_v30 = vadd.f32 %v1285_v38, %v1284_v15  ;;  %1428 = vst.msk [vmem:[%s1811_s25 + $0x24] ss:$8 sm:$0x3] %vm1813_vm6, %v1136_v37  ;;  %v1299_v42 = vrot.slane %v1296_v12, 7  ;;  %v1173_v51 = vsel %vm264_vm2, %v1171_v26, 0.0 }
 0x1de   : > { %v1160_v33 = vrot.slane %v1158_v29, 4  ;;  %v1211_v52 = vrot.slane %v1210_v9, 1 }
 0x1df   : > { %v1287_v39 = vrot.slane %v1286_v30, 1 }
 0x1e0   : > { %v1161_v41 = vadd.f32 %v1160_v33, %v1158_v29 }
 0x1e1   : > { %v1288_v5 = vadd.f32 %v1287_v39, %v1286_v30 }
 0x1e2   : > { %v1162_v34 = vrot.slane %v1161_v41, 2  ;;  %v1189_v43 = vpop.permute.xlu1 %1188 }
 0x1e3   : > { %v1295_v45 = vsel %vm287_vm15, %v1288_v5, 0.0  ;;  %v1195_v46 = vsel %vm1194_vm0, %v1189_v43, %v2155_v63  ;;  %v1176_v63 = vrot.slane %v1173_v51, 7 }
 0x1e4   : > { %v1163_v47 = vadd.f32 %v1162_v34, %v1161_v41  ;;  %v1300_v50 = vsel %vm312_vm5, %v1295_v45, %v1299_v42  ;;  %v1199_v48 = vmul.f32 %v2102_v10, %v1195_v46  ;;  %v1212_v10 = vadd.f32 %v1211_v52, %v1210_v9 }
 0x1e5   : > { %1432 = vst.msk [vmem:[%s1811_s25 + $0x30] ss:$8 sm:$0x3] %vm1813_vm6, %v1300_v50 }
 0x1e6   : > { %v1164_v35 = vrot.slane %v1163_v47, 1  ;;  %v1201_v49 = vrot.slane %v1199_v48, 4  ;;  %v1217_v59 = vrot.slane %v1212_v10, 7 }
 0x1e8   : > { %v1165_v44 = vadd.f32 %v1164_v35, %v1163_v47  ;;  %v1202_v53 = vadd.f32 %v1201_v49, %v1199_v48 }
 0x1ea   : > { %v1172_v55 = vsel %vm263_vm7, %v1165_v44, 0.0  ;;  %v1203_v21 = vrot.slane %v1202_v53, 2 }
 0x1eb   : > { %v1177_v57 = vsel %vm312_vm5, %v1172_v55, %v1176_v63 }
 0x1ec   : > { %1429 = vst.msk [vmem:[%s1811_s25 + $0x25] ss:$8 sm:$0x3] %vm1813_vm6, %v1177_v57  ;;  %v1204_v58 = vadd.f32 %v1203_v21, %v1202_v53 }
 0x1ee   : > { %v1205_v54 = vrot.slane %v1204_v58, 1 }
 0x1f0   : > { %v1206_v60 = vadd.f32 %v1205_v54, %v1204_v58 }
 0x1f2   : > { %v1218_v61 = vsel %vm312_vm5, %v1206_v60, %v1217_v59 }
 0x1f3   : > { %1430 = vst.msk [vmem:[%s1811_s25 + $0x26] ss:$8 sm:$0x3] %vm1813_vm6, %v1218_v61 }
 0x1f4 PF: > { %p15_p8 = scmp.ge.s32.totalorder %s1673_s14, 4   ;;  %s2251_s9 = smov %s1600_s10 }
 0x1f5   : > { %s2252_s10 = smov %s1604_s11  ;;  %s2253_s11 = smov %s1683_s17 }
 0x1f6   : > { %s2254_s12 = smov %s1673_s14  ;;  %17 = sbr.rel (!%p15_p8) target bundleno = 5 (0x5), region = 105 }
 0x1fb   :  { %1326 = vsyncpa [#allocation4], 1 }
 0x1fc   :  { %1328 = vsyncpa [#allocation4 + $0x1], 1 }
 0x1fd   :  { %1329 = vsyncpa [#allocation6], 1 }
 0x1fe   :  { %1331 = vsyncpa [#allocation6 + $0x1], 1 }

</bundles_post_ra>
